<compile_context>
chip_gen: v7x
topology: tpu7x:2x2x1
jax: 0.10.0
libtpu: 0.0.40
codegen_flags: <defaults>
</compile_context>

<pallas_src>
import jax
import jax.numpy as jnp
from jax.experimental import pallas as pl
from jax.experimental.pallas import tpu as pltpu

LANE = 128      # TPU lane width  (last dim)
SUBLANE = 8     # TPU sublane width (second-to-last dim)


def _round_up(n, m):
    return ((n + m - 1) // m) * m


# ---------------------------------------------------------------------------
# Kernel: fused MLP forward for one batch tile.
# ---------------------------------------------------------------------------
def mlp_kernel(x_ref, *refs):
    """refs = (w0, b0, w1, b1, ..., wL, bL, out_ref).

    ReLU between layers, identity on the output layer (nn.Identity).
    Hidden/output feature dims are pre-padded to 128-lane multiples by
    `prepare_params` (zero pad cols/rows + zero bias stay exactly 0 through
    ReLU, so the math is unchanged).
    """
    out_ref = refs[-1]
    wb = refs[:-1]
    n_layers = len(wb) // 2

    x = x_ref[...]                          # (tile_b, d_in) — natural, unpadded
    w0 = wb[0][...]                         # (d_in, n0_p)  or (d_in_p, n0_p)
    b0 = wb[1][...]                         # (1, n0_p)
    d_in = x.shape[1]

    if w0.shape[0] == d_in and d_in <= SUBLANE:
        # Layer 0 on the VPU: d_in is tiny (2 here), so a couple of
        # broadcast FMAs beat an almost-all-zero MXU pass and remove the need
        # to lane-pad x anywhere.
        h = b0
        for c in range(d_in):
            h = h + x[:, c:c + 1] * w0[c:c + 1, :]
    else:
        # General path for large d_in: lane-pad x in VMEM (hidden under the
        # matmul) and use the MXU.
        h = jnp.dot(jnp.pad(x, ((0, 0), (0, w0.shape[0] - d_in))), w0,
                    preferred_element_type=jnp.float32) + b0
    if n_layers > 1:                        # ReLU after the input layer
        h = jnp.maximum(h, 0.0)

    for l in range(1, n_layers):
        w = wb[2 * l][...]
        b = wb[2 * l + 1][...]
        h = jnp.dot(h, w, preferred_element_type=jnp.float32) + b
        if l < n_layers - 1:                # hidden layers get ReLU
            h = jnp.maximum(h, 0.0)

    out_ref[...] = h.astype(out_ref.dtype)


# ---------------------------------------------------------------------------
# One-time parameter padding (hoisted out of the per-call path).
# ---------------------------------------------------------------------------
def prepare_params(weights, biases):
    """Pad params to lane-dense shapes ONCE.

    `weights[l]` is [in_l, out_l] (transposed vs. PyTorch's [out, in]) so the
    kernel computes y = x @ W + b.  Output/hidden dims are padded to 128-lane
    multiples.  The layer-0 weight keeps its tiny d_in rows unpadded so the
    kernel can run layer 0 on the VPU without lane-padding x.
    """
    d_in = weights[0].shape[0]
    dims = [d_in] + [w.shape[1] for w in weights]
    first = d_in if d_in <= SUBLANE else _round_up(max(d_in, LANE), LANE)
    dims_p = [first] + [_round_up(max(d, LANE), LANE) for d in dims[1:]]

    w_p, b_p = [], []
    for l, (w, b) in enumerate(zip(weights, biases)):
        wp = jnp.zeros((dims_p[l], dims_p[l + 1]), jnp.float32)
        wp = wp.at[: w.shape[0], : w.shape[1]].set(w)
        bp = jnp.zeros((1, dims_p[l + 1]), jnp.float32)
        bp = bp.at[:, : b.shape[1]].set(b)
        w_p.append(wp)
        b_p.append(bp)
    return w_p, b_p


# ---------------------------------------------------------------------------
# Forward wrapper: tile over the batch and call the fused kernel.
# ---------------------------------------------------------------------------
def neural_net_forward(x, w_p, b_p, *, max_tile_b=512):
    """Returns the lane-dense padded output (B, d_out_padded).

    The caller selects the real output columns lazily (avoids forcing a
    lane-sparse masked-store copy right after the Pallas call).
    """
    B, d_in = x.shape
    d_out_p = w_p[-1].shape[1]

    # ---- batch tile: 2-4 grid steps (>=2 per TC on v7x, overlap on v5e/v6e)
    B8 = _round_up(B, SUBLANE)
    if B8 <= 256:
        tile_b = B8
    else:
        tile_b = min(max_tile_b, max(256, _round_up(pl.cdiv(B8, 4), SUBLANE)))
    B_pad = _round_up(B, tile_b)
    x_in = x if B_pad == B else jnp.pad(x, ((0, B_pad - B), (0, 0)))

    grid = (B_pad // tile_b,)
    in_specs = [pl.BlockSpec((tile_b, d_in), lambda i: (i, 0))]
    args = [x_in]
    for wp, bp in zip(w_p, b_p):
        # Grid-invariant blocks: fetched once, stay resident in VMEM.
        in_specs.append(pl.BlockSpec(wp.shape, lambda i: (0, 0)))
        in_specs.append(pl.BlockSpec(bp.shape, lambda i: (0, 0)))
        args.append(wp)
        args.append(bp)

    # ---- advisory cost + VMEM budget sized from actual usage ---------------
    dims_p = [w_p[0].shape[0]] + [w.shape[1] for w in w_p]
    flops = 2 * B_pad * sum(a * b for a, b in zip(dims_p[:-1], dims_p[1:]))
    param_bytes = 4 * sum(w.size + b.size for w, b in zip(w_p, b_p))
    bytes_acc = 4 * (x_in.size + B_pad * d_out_p) + param_bytes
    n_max = max(w.shape[1] for w in w_p)
    vmem_need = (param_bytes                                   # resident params
                 + 4 * 2 * tile_b * (max(d_in, LANE) + d_out_p)  # x/out dbl-buf
                 + 4 * 2 * tile_b * n_max)                     # live activations
    vmem_limit = min(32 * 1024 * 1024, max(4 * 1024 * 1024, 2 * vmem_need))

    out = pl.pallas_call(
        mlp_kernel,
        out_shape=jax.ShapeDtypeStruct((B_pad, d_out_p), jnp.float32),
        grid=grid,
        in_specs=in_specs,
        out_specs=pl.BlockSpec((tile_b, d_out_p), lambda i: (i, 0)),
        compiler_params=pltpu.CompilerParams(
            dimension_semantics=("parallel",),   # batch axis shards across TCs on v7x
            vmem_limit_bytes=vmem_limit),
        cost_estimate=pl.CostEstimate(
            flops=flops, transcendentals=0, bytes_accessed=bytes_acc),
    )(*args)

    # Slice only the batch padding (no-op when B % tile_b == 0); keep lanes dense.
    return out if B_pad == B else out[:B]


# ---------------------------------------------------------------------------
# Init + reference (matches PyTorch init_xavier semantics: Xavier-uniform with
# tanh gain 5/3, zero biases).
# ---------------------------------------------------------------------------
def init_params(key, input_dim, output_dim, n_hidden_layers, neurons):
    layer_sizes = (
        [(input_dim, neurons)]
        + [(neurons, neurons)] * (n_hidden_layers - 1)
        + [(neurons, output_dim)]
    )
    gain = 5.0 / 3.0  # nn.init.calculate_gain('tanh')
    weights, biases = [], []
    for fan_in, fan_out in layer_sizes:
        key, sub = jax.random.split(key)
        bound = gain * (6.0 / (fan_in + fan_out)) ** 0.5
        w = jax.random.uniform(sub, (fan_in, fan_out), jnp.float32,
                               minval=-bound, maxval=bound)
        b = jnp.zeros((1, fan_out), jnp.float32)
        weights.append(w)
        biases.append(b)
    return weights, biases


def reference_forward(x, weights, biases):
    h = x
    n = len(weights)
    for l in range(n):
        h = h @ weights[l] + biases[l]
        if l < n - 1:
            h = jnp.maximum(h, 0.0)
    return h


if __name__ == "__main__":
    # Module config (consistent with NeuralNet.__init__ shapes).
    input_dimension = 2
    output_dimension = 1
    n_hidden_layers = 3
    neurons = 32
    batch = 1024          # tile_b=256 -> grid=(4,): >=2 steps/TC on v7x, 4 serial steps on v5e/v6e

    key = jax.random.PRNGKey(0)
    key_x, key_p = jax.random.split(key)
    x = jax.random.normal(key_x, (batch, input_dimension), jnp.float32)
    weights, biases = init_params(
        key_p, input_dimension, output_dimension, n_hidden_layers, neurons)

    # Pad parameters ONCE (hoisted out of the per-call hot path).
    w_p, b_p = prepare_params(weights, biases)

    out_padded = neural_net_forward(x, w_p, b_p)
    out_padded = jax.block_until_ready(out_padded)

    # Consumer-side column selection (keeps the kernel's stores lane-dense).
    out = out_padded[:, :output_dimension]
    ref = reference_forward(x, weights, biases)
    assert out.shape == (batch, output_dimension)
    assert jnp.allclose(out, ref, atol=1e-5, rtol=1e-5)

    print("KERNEL_OK")
</pallas_src>

<mosaic_0001>
module attributes {stable_mosaic.version = 11 : i64} {
  func.func @mlp_kernel(%arg0: i32, %arg1: memref<256x2xf32, #tpu.memory_space<vmem>>, %arg2: memref<2x128xf32, #tpu.memory_space<vmem>>, %arg3: memref<1x128xf32, #tpu.memory_space<vmem>>, %arg4: memref<128x128xf32, #tpu.memory_space<vmem>>, %arg5: memref<1x128xf32, #tpu.memory_space<vmem>>, %arg6: memref<128x128xf32, #tpu.memory_space<vmem>>, %arg7: memref<1x128xf32, #tpu.memory_space<vmem>>, %arg8: memref<128x128xf32, #tpu.memory_space<vmem>>, %arg9: memref<1x128xf32, #tpu.memory_space<vmem>>, %arg10: memref<256x128xf32, #tpu.memory_space<vmem>>) attributes {dimension_semantics = [#tpu.dimension_semantics<parallel>], iteration_bounds = array<i64: 4>, scalar_prefetch = 0 : i64, scratch_operands = 0 : i64, tpu.core_type = #tpu.core_type<tc>, window_params = [{transform_indices = @transform_0, window_bounds = array<i64: 256, 2>}, {pipeline_mode = #tpu.pipeline_mode<synchronous>, transform_indices = @transform_1, window_bounds = array<i64: 2, 128>}, {pipeline_mode = #tpu.pipeline_mode<synchronous>, transform_indices = @transform_2, window_bounds = array<i64: 1, 128>}, {pipeline_mode = #tpu.pipeline_mode<synchronous>, transform_indices = @transform_3, window_bounds = array<i64: 128, 128>}, {pipeline_mode = #tpu.pipeline_mode<synchronous>, transform_indices = @transform_4, window_bounds = array<i64: 1, 128>}, {pipeline_mode = #tpu.pipeline_mode<synchronous>, transform_indices = @transform_5, window_bounds = array<i64: 128, 128>}, {pipeline_mode = #tpu.pipeline_mode<synchronous>, transform_indices = @transform_6, window_bounds = array<i64: 1, 128>}, {pipeline_mode = #tpu.pipeline_mode<synchronous>, transform_indices = @transform_7, window_bounds = array<i64: 128, 128>}, {pipeline_mode = #tpu.pipeline_mode<synchronous>, transform_indices = @transform_8, window_bounds = array<i64: 1, 128>}, {transform_indices = @transform_9, window_bounds = array<i64: 256, 128>}]} {
    %c0 = arith.constant 0 : index
    %c0_0 = arith.constant 0 : index
    %0 = vector.load %arg1[%c0, %c0_0] : memref<256x2xf32, #tpu.memory_space<vmem>>, vector<256x2xf32>
    %c0_1 = arith.constant 0 : index
    %c0_2 = arith.constant 0 : index
    %1 = vector.load %arg2[%c0_1, %c0_2] : memref<2x128xf32, #tpu.memory_space<vmem>>, vector<2x128xf32>
    %c0_3 = arith.constant 0 : index
    %c0_4 = arith.constant 0 : index
    %2 = vector.load %arg3[%c0_3, %c0_4] : memref<1x128xf32, #tpu.memory_space<vmem>>, vector<1x128xf32>
    %3 = vector.extract_strided_slice %0 {offsets = [0, 0], sizes = [256, 1], strides = [1, 1]} : vector<256x2xf32> to vector<256x1xf32>
    %4 = vector.extract_strided_slice %1 {offsets = [0, 0], sizes = [1, 128], strides = [1, 1]} : vector<2x128xf32> to vector<1x128xf32>
    %5 = vector.broadcast %3 : vector<256x1xf32> to vector<256x128xf32>
    %6 = vector.broadcast %4 : vector<1x128xf32> to vector<256x128xf32>
    %7 = arith.mulf %5, %6 : vector<256x128xf32>
    %8 = vector.broadcast %2 : vector<1x128xf32> to vector<256x128xf32>
    %9 = arith.addf %8, %7 : vector<256x128xf32>
    %10 = vector.extract_strided_slice %0 {offsets = [0, 1], sizes = [256, 1], strides = [1, 1]} : vector<256x2xf32> to vector<256x1xf32>
    %11 = vector.extract_strided_slice %1 {offsets = [1, 0], sizes = [1, 128], strides = [1, 1]} : vector<2x128xf32> to vector<1x128xf32>
    %12 = vector.broadcast %10 : vector<256x1xf32> to vector<256x128xf32>
    %13 = vector.broadcast %11 : vector<1x128xf32> to vector<256x128xf32>
    %14 = arith.mulf %12, %13 : vector<256x128xf32>
    %15 = arith.addf %9, %14 : vector<256x128xf32>
    %cst = arith.constant 0.000000e+00 : f32
    %16 = vector.broadcast %cst : f32 to vector<256x128xf32>
    %17 = arith.maximumf %15, %16 : vector<256x128xf32>
    %c0_5 = arith.constant 0 : index
    %c0_6 = arith.constant 0 : index
    %18 = vector.load %arg4[%c0_5, %c0_6] : memref<128x128xf32, #tpu.memory_space<vmem>>, vector<128x128xf32>
    %c0_7 = arith.constant 0 : index
    %c0_8 = arith.constant 0 : index
    %19 = vector.load %arg5[%c0_7, %c0_8] : memref<1x128xf32, #tpu.memory_space<vmem>>, vector<1x128xf32>
    %cst_9 = arith.constant dense<0.000000e+00> : vector<256x128xf32>
    %20 = tpu.matmul %17, %18, %cst_9 {dimension_numbers = #tpu.dot_dimension_numbers<[1], [0], [0], [1], [0, 0, 1, 1], [], []>} : vector<256x128xf32>, vector<128x128xf32>, vector<256x128xf32> -> vector<256x128xf32>
    %21 = vector.broadcast %19 : vector<1x128xf32> to vector<256x128xf32>
    %22 = arith.addf %20, %21 : vector<256x128xf32>
    %cst_10 = arith.constant 0.000000e+00 : f32
    %23 = vector.broadcast %cst_10 : f32 to vector<256x128xf32>
    %24 = arith.maximumf %22, %23 : vector<256x128xf32>
    %c0_11 = arith.constant 0 : index
    %c0_12 = arith.constant 0 : index
    %25 = vector.load %arg6[%c0_11, %c0_12] : memref<128x128xf32, #tpu.memory_space<vmem>>, vector<128x128xf32>
    %c0_13 = arith.constant 0 : index
    %c0_14 = arith.constant 0 : index
    %26 = vector.load %arg7[%c0_13, %c0_14] : memref<1x128xf32, #tpu.memory_space<vmem>>, vector<1x128xf32>
    %cst_15 = arith.constant dense<0.000000e+00> : vector<256x128xf32>
    %27 = tpu.matmul %24, %25, %cst_15 {dimension_numbers = #tpu.dot_dimension_numbers<[1], [0], [0], [1], [0, 0, 1, 1], [], []>} : vector<256x128xf32>, vector<128x128xf32>, vector<256x128xf32> -> vector<256x128xf32>
    %28 = vector.broadcast %26 : vector<1x128xf32> to vector<256x128xf32>
    %29 = arith.addf %27, %28 : vector<256x128xf32>
    %cst_16 = arith.constant 0.000000e+00 : f32
    %30 = vector.broadcast %cst_16 : f32 to vector<256x128xf32>
    %31 = arith.maximumf %29, %30 : vector<256x128xf32>
    %c0_17 = arith.constant 0 : index
    %c0_18 = arith.constant 0 : index
    %32 = vector.load %arg8[%c0_17, %c0_18] : memref<128x128xf32, #tpu.memory_space<vmem>>, vector<128x128xf32>
    %c0_19 = arith.constant 0 : index
    %c0_20 = arith.constant 0 : index
    %33 = vector.load %arg9[%c0_19, %c0_20] : memref<1x128xf32, #tpu.memory_space<vmem>>, vector<1x128xf32>
    %cst_21 = arith.constant dense<0.000000e+00> : vector<256x128xf32>
    %34 = tpu.matmul %31, %32, %cst_21 {dimension_numbers = #tpu.dot_dimension_numbers<[1], [0], [0], [1], [0, 0, 1, 1], [], []>} : vector<256x128xf32>, vector<128x128xf32>, vector<256x128xf32> -> vector<256x128xf32>
    %35 = vector.broadcast %33 : vector<1x128xf32> to vector<256x128xf32>
    %36 = arith.addf %34, %35 : vector<256x128xf32>
    %c0_22 = arith.constant 0 : index
    %c0_23 = arith.constant 0 : index
    %37 = vector.load %arg10[%c0_22, %c0_23] : memref<256x128xf32, #tpu.memory_space<vmem>>, vector<256x128xf32>
    tpu.vector_store %arg10[%c0_22, %c0_23], %36 {strides = array<i32>} : memref<256x128xf32, #tpu.memory_space<vmem>>, vector<256x128xf32>,
    return
  }
  func.func @transform_0(%arg0: i32) -> (i32, i32) {
    %c0_i32 = arith.constant 0 : i32
    %c0_i32_0 = arith.constant 0 : i32
    return %arg0, %c0_i32 : i32, i32
  }
  func.func @transform_1(%arg0: i32) -> (i32, i32) {
    %c0_i32 = arith.constant 0 : i32
    %c0_i32_0 = arith.constant 0 : i32
    %c0_i32_1 = arith.constant 0 : i32
    return %c0_i32, %c0_i32_0 : i32, i32
  }
  func.func @transform_2(%arg0: i32) -> (i32, i32) {
    %c0_i32 = arith.constant 0 : i32
    %c0_i32_0 = arith.constant 0 : i32
    %c0_i32_1 = arith.constant 0 : i32
    return %c0_i32, %c0_i32_0 : i32, i32
  }
  func.func @transform_3(%arg0: i32) -> (i32, i32) {
    %c0_i32 = arith.constant 0 : i32
    %c0_i32_0 = arith.constant 0 : i32
    %c0_i32_1 = arith.constant 0 : i32
    return %c0_i32, %c0_i32_0 : i32, i32
  }
  func.func @transform_4(%arg0: i32) -> (i32, i32) {
    %c0_i32 = arith.constant 0 : i32
    %c0_i32_0 = arith.constant 0 : i32
    %c0_i32_1 = arith.constant 0 : i32
    return %c0_i32, %c0_i32_0 : i32, i32
  }
  func.func @transform_5(%arg0: i32) -> (i32, i32) {
    %c0_i32 = arith.constant 0 : i32
    %c0_i32_0 = arith.constant 0 : i32
    %c0_i32_1 = arith.constant 0 : i32
    return %c0_i32, %c0_i32_0 : i32, i32
  }
  func.func @transform_6(%arg0: i32) -> (i32, i32) {
    %c0_i32 = arith.constant 0 : i32
    %c0_i32_0 = arith.constant 0 : i32
    %c0_i32_1 = arith.constant 0 : i32
    return %c0_i32, %c0_i32_0 : i32, i32
  }
  func.func @transform_7(%arg0: i32) -> (i32, i32) {
    %c0_i32 = arith.constant 0 : i32
    %c0_i32_0 = arith.constant 0 : i32
    %c0_i32_1 = arith.constant 0 : i32
    return %c0_i32, %c0_i32_0 : i32, i32
  }
  func.func @transform_8(%arg0: i32) -> (i32, i32) {
    %c0_i32 = arith.constant 0 : i32
    %c0_i32_0 = arith.constant 0 : i32
    %c0_i32_1 = arith.constant 0 : i32
    return %c0_i32, %c0_i32_0 : i32, i32
  }
  func.func @transform_9(%arg0: i32) -> (i32, i32) {
    %c0_i32 = arith.constant 0 : i32
    %c0_i32_0 = arith.constant 0 : i32
    return %arg0, %c0_i32 : i32, i32
  }
}

</mosaic_0001>

<bundles_post_ra>
// kernel: tpu_custom_call.1
= control target key start
LH: loop header
LB: loop body
LE: loop exit
PB: predicated region body
PF: predicated region fallthrough
CT: control target
= control target key end

     0   :  { %14 = vsyncpa [#allocation3], 0  ;;  %s3089_s0 = inlined_call_operand.vmem [shape: f32[1024,2], index: 0, kind: input, shape index: {}]   ;;  %s3090_s1 = inlined_call_operand.vmem [shape: f32[2,128], index: 1, kind: input, shape index: {}]   ;;  %s3091_s2 = inlined_call_operand.vmem [shape: f32[1,128], index: 2, kind: input, shape index: {}]   ;;  %s3092_s3 = inlined_call_operand.vmem [shape: f32[128,128], index: 3, kind: input, shape index: {}]   ;;  %s3093_s4 = inlined_call_operand.vmem [shape: f32[1,128], index: 4, kind: input, shape index: {}]   ;;  %s3094_s5 = inlined_call_operand.vmem [shape: f32[128,128], index: 5, kind: input, shape index: {}]   ;;  %s3095_s6 = inlined_call_operand.vmem [shape: f32[1,128], index: 6, kind: input, shape index: {}]   ;;  %s3096_s7 = inlined_call_operand.vmem [shape: f32[128,128], index: 7, kind: input, shape index: {}]   ;;  %s3097_s8 = inlined_call_operand.vmem [shape: f32[1,128], index: 8, kind: input, shape index: {}]   ;;  %s3098_s9 = inlined_call_operand.hbm [shape: f32[1024,128], index: 9, kind: output, shape index: {}]  }
   0x1   :  { %16 = vsyncpa [#allocation3 + $0x1], 0  ;;  %s2455_s30 = smov 0   ;;  %s2457_s10 = smov 0  }
   0x2   :  { %s2459_s11 = smov 0   ;;  %s2461_s12 = smov 0  }
   0x3 LB: > { %s2476_s13 = sadd.s32 4294967295, %s2398_s12   ;;  %s1746_s14 = sadd.s32 4294967294, %s2398_s12   ;;  %s2398_s12 = sphi %s2461_s12, %s3104_s12   ;;  %s2394_s11 = sphi %s2459_s11, %s3103_s11   ;;  %s2390_s10 = sphi %s2457_s10, %s3102_s10   ;;  %s2386_s30 = sphi %s2455_s30, %s3101_s30  }
   0x4   : > { %s2480_s15 = sadd.s32 1, %s2398_s12   ;;  %s223_s16 = sadd.s32 1, %s2394_s11 }
   0x5   : > { %s220_s17 = ssub.s32 %s2398_s12, %s2480_s15  ;;  %p233_p0 = scmp.ne.s32.totalorder %s2394_s11, %s2390_s10 }
   0x6   : > { %p221_p1 = scmp.eq.s32.totalorder %s220_s17, 0  ;;  %p234_p2 = scmp.eq.s32.totalorder %s2476_s13, 3 }
   0x7   : > { %p239_p3 = scmp.ne.s32.totalorder %s2390_s10, %s2386_s30  ;;  %p240_p4 = scmp.eq.s32.totalorder %s1746_s14, 3 }
   0x8   : > { %s2491_s18 = scalar_select %p221_p1, %s2394_s11, %s223_s16  }
   0x9   : > { %p2493_p5 = por %p234_p2, %p233_p0  ;;  %p2497_p6 = por %p240_p4, %p239_p3 }
   0xa   : > { %p1749_p7 = scmp.ge.s32.totalorder %s2398_s12, 1  ;;  %p291_p8 = scmp.lt.s32.totalorder %s2398_s12, 5 }
   0xc   : > { %p292_p9 = pnand %p1749_p7, %p291_p8 }
   0xd   : > { %s1751_s21 = sshll.u32 (!%p292_p9), %s2476_s13, 5  ;;  %v2400_v0 = vmov (!%p292_p9), 1   ;;  %v2401_v7 = vmov (!%p292_p9), 0   ;;  %v830_v8 = vld [vmem:[%s3092_s3] sm:$0xff] (!%p292_p9)  ;;  %v831_v10 = vld [vmem:[%s3092_s3 + $0x8] sm:$0xff] (!%p292_p9)  ;;  %v832_v12 = vld [vmem:[%s3092_s3 + $0x10] sm:$0xff] (!%p292_p9)  ;;  %v528_v63 = vlaneseq (!%p292_p9) }
   0xe   : > { %295 = sbr.rel (%p292_p9) target bundleno = 1007 (0x3ef), region = 56  ;;  %2304 = vset.pattern.permute.xlu0 (!%p292_p9), %v2400_v0  ;;  %2302 = vset.pattern.permute.xlu1 (!%p292_p9), %v2400_v0  ;;  %p328_p10 = scmp.lt.s32.totalorder (!%p292_p9), %s1751_s21, 127  ;;  %v2147_v11 = vpack.c.bf16 (!%p292_p9), %v831_v10, %v830_v8  ;;  %v833_v13 = vld [vmem:[%s3092_s3 + $0x18] sm:$0xff] (!%p292_p9)  ;;  %v834_v16 = vld [vmem:[%s3092_s3 + $0x20] sm:$0xff] (!%p292_p9)  ;;  %v835_v17 = vld [vmem:[%s3092_s3 + $0x28] sm:$0xff] (!%p292_p9) }
   0xf   : > { %v2151_v14 = vpack.c.bf16 (!%p292_p9), %v833_v13, %v832_v12  ;;  %v2155_v18 = vpack.c.bf16 (!%p292_p9), %v835_v17, %v834_v16  ;;  %v836_v21 = vld [vmem:[%s3092_s3 + $0x30] sm:$0xff] (!%p292_p9)  ;;  %v837_v22 = vld [vmem:[%s3092_s3 + $0x38] sm:$0xff] (!%p292_p9)  ;;  %v838_v25 = vld [vmem:[%s3092_s3 + $0x40] sm:$0xff] (!%p292_p9)  ;;  %s324_s24 = sand.u32 (!%p292_p9), 1, %s2390_s10   ;;  %s1762_s29 = sshll.u32 (!%p292_p9), %s2476_s13, 12 }
  0x10   : > { %2148 = vmatprep.subr.bf16.mxu0 (!%p292_p9), %v2147_v11  ;;  %2243 = vmatprep.subr.bf16.mxu1 (!%p292_p9), %v2147_v11  ;;  %v2159_v23 = vpack.c.bf16 (!%p292_p9), %v837_v22, %v836_v21  ;;  %v839_v26 = vld [vmem:[%s3092_s3 + $0x48] sm:$0xff] (!%p292_p9)  ;;  %v840_v29 = vld [vmem:[%s3092_s3 + $0x50] sm:$0xff] (!%p292_p9)  ;;  %v841_v30 = vld [vmem:[%s3092_s3 + $0x58] sm:$0xff] (!%p292_p9)  ;;  %s1750_s26 = sshll.u32 (!%p292_p9), %s324_s24, 8  ;;  %s3048_s13 = scalar_lea.sflag (!%p292_p9), [#allocation3], %s324_s24 }
  0x11   : > { %2150 = vmatpush3.bf16.msra.mxu0 (!%p292_p9), %v2147_v11  ;;  %2251 = vmatpush3.bf16.msra.mxu1 (!%p292_p9), %v2147_v11  ;;  %v2163_v27 = vpack.c.bf16 (!%p292_p9), %v839_v26, %v838_v25  ;;  %v2167_v31 = vpack.c.bf16 (!%p292_p9), %v841_v30, %v840_v29  ;;  %v842_v33 = vld [vmem:[%s3092_s3 + $0x60] sm:$0xff] (!%p292_p9)  ;;  %v843_v34 = vld [vmem:[%s3092_s3 + $0x68] sm:$0xff] (!%p292_p9)  ;;  %v844_v36 = vld [vmem:[%s3092_s3 + $0x70] sm:$0xff] (!%p292_p9)  ;;  %s2402_s23 = smov (!%p292_p9), [#allocation2]  }
  0x12   : > { %2152 = vmatprep.subr.bf16.mxu0 (!%p292_p9), %v2151_v14  ;;  %2244 = vmatprep.subr.bf16.mxu1 (!%p292_p9), %v2151_v14  ;;  %v2171_v35 = vpack.c.bf16 (!%p292_p9), %v843_v34, %v842_v33  ;;  %v845_v37 = vld [vmem:[%s3092_s3 + $0x78] sm:$0xff] (!%p292_p9)  ;;  %v366_v11 = vld [vmem:[%s3090_s1] sm:$0x3] (!%p292_p9) }
  0x13   : > { %v2175_v38 = vpack.c.bf16 (!%p292_p9), %v845_v37, %v844_v36  ;;  %v2679_v17 = vld [vmem:[%s3091_s2] ss:$0 sm:$0xff] (!%p292_p9) }
  0x15   : > { %s3106_s21 = smov (!%p328_p10, %s1751_s21), 127  ;;  %2154 = vmatpush3.bf16.msra.mxu0 %v2151_v14  ;;  %2252 = vmatpush3.bf16.msra.mxu1 %v2151_v14 }
  0x16   : > { %s1752_s22 = sshll.u32 %s3106_s21, 3  ;;  %2156 = vmatprep.subr.bf16.mxu0 %v2155_v18  ;;  %2245 = vmatprep.subr.bf16.mxu1 %v2155_v18  ;;  %s3039_s21 = scalar_lea.hbm %s3098_s9, %s1762_s29 }
  0x17   : > { %s2509_s25 = scalar_lea.vmem %s3089_s0, %s1752_s22 }
  0x18   : > { %v2512_v1 = vld [vmem:[%s2509_s25 + $0x10] sm:$0xff]  ;;  %v2515_v2 = vld [vmem:[%s2509_s25] sm:$0xff]  ;;  %v2523_v4 = vld [vmem:[%s2509_s25 + $0x8] sm:$0xff] }
  0x19   : > { %611 = vperm.xlu0 %2304, %v2512_v1   ;;  %603 = vperm.xlu1 %2302, %v2515_v2   ;;  %v2520_v3 = vld [vmem:[%s2509_s25 + $0x30] sm:$0xff]  ;;  %v337_v6 = vld [vmem:[%s2509_s25 + $0x18] sm:$0xff]  ;;  %v338_v19 = vld [vmem:[%s2509_s25 + $0x20] sm:$0xff] }
  0x1a   : > { %v2528_v5 = vld [vmem:[%s2509_s25 + $0x50] sm:$0xff]  ;;  %2158 = vmatpush3.bf16.msra.mxu0 %v2155_v18  ;;  %v339_v28 = vld [vmem:[%s2509_s25 + $0x28] sm:$0xff]  ;;  %2253 = vmatpush3.bf16.msra.mxu1 %v2155_v18  ;;  %v341_v32 = vld [vmem:[%s2509_s25 + $0x38] sm:$0xff] }
  0x1b   : > { %v2537_v9 = vld [vmem:[%s2509_s25 + $0x70] sm:$0xff]  ;;  %2160 = vmatprep.subr.bf16.mxu0 %v2159_v23  ;;  %2246 = vmatprep.subr.bf16.mxu1 %v2159_v23  ;;  %v342_v39 = vld [vmem:[%s2509_s25 + $0x40] sm:$0xff]  ;;  %v343_v40 = vld [vmem:[%s2509_s25 + $0x48] sm:$0xff] }
  0x1c   : > { %v2551_v15 = vld [vmem:[%s2509_s25 + $0x90] sm:$0xff]  ;;  %v347_v41 = vld [vmem:[%s2509_s25 + $0x68] sm:$0xff]  ;;  %v345_v42 = vld [vmem:[%s2509_s25 + $0x58] sm:$0xff] }
  0x1d   : > { %627 = vperm.xlu0 %2304, %v2520_v3   ;;  %607 = vperm.xlu1 %2302, %v2523_v4   ;;  %v2562_v20 = vld [vmem:[%s2509_s25 + $0xb0] sm:$0xff]  ;;  %v351_v43 = vld [vmem:[%s2509_s25 + $0x88] sm:$0xff]  ;;  %v346_v44 = vld [vmem:[%s2509_s25 + $0x60] sm:$0xff] }
  0x1e   : > { %v2573_v24 = vld [vmem:[%s2509_s25 + $0xd0] sm:$0xff]  ;;  %2162 = vmatpush3.bf16.msra.mxu0 %v2159_v23  ;;  %2254 = vmatpush3.bf16.msra.mxu1 %v2159_v23  ;;  %v355_v45 = vld [vmem:[%s2509_s25 + $0xa8] sm:$0xff]  ;;  %v349_v47 = vld [vmem:[%s2509_s25 + $0x78] sm:$0xff] }
  0x1f   : > { %2164 = vmatprep.subr.bf16.mxu0 %v2163_v27  ;;  %2247 = vmatprep.subr.bf16.mxu1 %v2163_v27  ;;  %v359_v46 = vld [vmem:[%s2509_s25 + $0xc8] sm:$0xff]  ;;  %v350_v49 = vld [vmem:[%s2509_s25 + $0x80] sm:$0xff]  ;;  %v364_v50 = vld [vmem:[%s2509_s25 + $0xf0] sm:$0xff] }
  0x20   : > { %v2633_v48 = vld [vmem:[%s2509_s25 + $0xe8] sm:$0xff]  ;;  %v353_v51 = vld [vmem:[%s2509_s25 + $0x98] sm:$0xff]  ;;  %v354_v52 = vld [vmem:[%s2509_s25 + $0xa0] sm:$0xff] }
  0x21   : > { %643 = vperm.xlu0 %2304, %v2528_v5   ;;  %2303 = vset.pattern.permute.xlu1 %v2401_v7  ;;  %v357_v53 = vld [vmem:[%s2509_s25 + $0xb8] sm:$0xff]  ;;  %v358_v60 = vld [vmem:[%s2509_s25 + $0xc0] sm:$0xff] }
  0x22   : > { %385 = vperm.xlu1 %2303, %v337_v6   ;;  %2166 = vmatpush3.bf16.msra.mxu0 %v2163_v27  ;;  %v362_v22 = vld [vmem:[%s2509_s25 + $0xe0] sm:$0xff] }
  0x23   : > { %2168 = vmatprep.subr.bf16.mxu0 %v2167_v31  ;;  %2255 = vmatpush3.bf16.msra.mxu1 %v2163_v27 }
  0x24   : > { %2248 = vmatprep.subr.bf16.mxu1 %v2167_v31 }
  0x25   : > { %659 = vperm.xlu0 %2304, %v2537_v9  }
  0x26   : > { %2305 = vset.pattern.permute.xlu1 %v2400_v0  ;;  %2170 = vmatpush3.bf16.msra.mxu0 %v2167_v31 }
  0x27   : > { %615 = vperm.xlu1 %2305, %v337_v6   ;;  %2172 = vmatprep.subr.bf16.mxu0 %v2171_v35 }
  0x28   : > { %2256 = vmatpush3.bf16.msra.mxu1 %v2167_v31 }
  0x29   : > { %675 = vperm.xlu0 %2304, %v2551_v15   ;;  %2249 = vmatprep.subr.bf16.mxu1 %v2171_v35 }
  0x2a   : > { %2174 = vmatpush3.bf16.msra.mxu0 %v2171_v35 }
  0x2b   : > { %2306 = vset.pattern.permute.xlu1 %v2401_v7  ;;  %2176 = vmatprep.subr.bf16.mxu0 %v2175_v38 }
  0x2c   : > { %390 = vperm.xlu1 %2306, %v338_v19   ;;  %2257 = vmatpush3.bf16.msra.mxu1 %v2171_v35 }
  0x2d   : > { %691 = vperm.xlu0 %2304, %v2562_v20   ;;  %2250 = vmatprep.subr.bf16.mxu1 %v2175_v38 }
  0x2e   : > { %2178 = vmatpush3.bf16.msra.mxu0 %v2175_v38 }
  0x30   : > { %2307 = vset.pattern.permute.xlu1 %v2400_v0  ;;  %2258 = vmatpush3.bf16.msra.mxu1 %v2175_v38 }
  0x31   : > { %707 = vperm.xlu0 %2304, %v2573_v24   ;;  %619 = vperm.xlu1 %2307, %v338_v19  }
  0x35   : > { %2329 = vset.pattern.permute.xlu0 %v2401_v7  ;;  %623 = vperm.xlu1 %2307, %v339_v28  }
  0x36   : > { %370 = vperm.xlu0 %2329, %v2515_v2  }
  0x39   : > { %2308 = vset.pattern.permute.xlu1 %v2401_v7 }
  0x3a   : > { %375 = vperm.xlu0 %2329, %v2523_v4   ;;  %405 = vperm.xlu1 %2308, %v341_v32  }
  0x3e   : > { %380 = vperm.xlu0 %2329, %v2512_v1   ;;  %2309 = vset.pattern.permute.xlu1 %v2400_v0 }
  0x3f   : > { %631 = vperm.xlu1 %2309, %v341_v32  }
  0x42   : > { %395 = vperm.xlu0 %2329, %v339_v28  }
  0x43   : > { %2310 = vset.pattern.permute.xlu1 %v2401_v7 }
  0x44   : > { %410 = vperm.xlu1 %2310, %v342_v39  }
  0x46   : > { %400 = vperm.xlu0 %2329, %v2520_v3   ;;  %v529_v3 = vshrl.u32 %v528_v63, 7 }
  0x48   : > { %2311 = vset.pattern.permute.xlu1 %v2400_v0  ;;  %v732_v6 = vsub.s32 1, %v529_v3  ;;  %v530_v8 = vsub.s32 0, %v529_v3 }
  0x49   : > { %635 = vperm.xlu1 %2311, %v342_v39  }
  0x4a   : > { %415 = vperm.xlu0 %2329, %v343_v40   ;;  %v2670_v12 = vrot.slane %v366_v11, %v732_v6  ;;  %v2672_v13 = vrot.slane %v366_v11, %v530_v8 }
  0x4d   : > { %639 = vperm.xlu1 %2311, %v343_v40  }
  0x4e   : > { %420 = vperm.xlu0 %2329, %v2528_v5   ;;  %v361_v5 = vld [vmem:[%s2509_s25 + $0xd8] sm:$0xff] }
  0x51   : > { %2312 = vset.pattern.permute.xlu1 %v2401_v7 }
  0x52   : > { %435 = vperm.xlu0 %2329, %v347_v41   ;;  %425 = vperm.xlu1 %2312, %v345_v42  }
  0x56   : > { %440 = vperm.xlu0 %2329, %v2537_v9   ;;  %2313 = vset.pattern.permute.xlu1 %v2400_v0 }
  0x57   : > { %647 = vperm.xlu1 %2313, %v345_v42  }
  0x5a   : > { %455 = vperm.xlu0 %2329, %v351_v43  }
  0x5b   : > { %2314 = vset.pattern.permute.xlu1 %v2401_v7 }
  0x5c   : > { %430 = vperm.xlu1 %2314, %v346_v44  }
  0x5e   : > { %460 = vperm.xlu0 %2329, %v2551_v15  }
  0x60   : > { %2315 = vset.pattern.permute.xlu1 %v2400_v0 }
  0x61   : > { %651 = vperm.xlu1 %2315, %v346_v44  }
  0x62   : > { %475 = vperm.xlu0 %2329, %v355_v45  }
  0x65   : > { %655 = vperm.xlu1 %2315, %v347_v41  }
  0x66   : > { %480 = vperm.xlu0 %2329, %v2562_v20  }
  0x69   : > { %2316 = vset.pattern.permute.xlu1 %v2401_v7 }
  0x6a   : > { %495 = vperm.xlu0 %2329, %v359_v46   ;;  %445 = vperm.xlu1 %2316, %v349_v47  }
  0x6e   : > { %500 = vperm.xlu0 %2329, %v2573_v24   ;;  %2317 = vset.pattern.permute.xlu1 %v2400_v0 }
  0x6f   : > { %663 = vperm.xlu1 %2317, %v349_v47  }
  0x72   : > { %515 = vperm.xlu0 %2329, %v2633_v48  }
  0x73   : > { %2318 = vset.pattern.permute.xlu1 %v2401_v7 }
  0x74   : > { %450 = vperm.xlu1 %2318, %v350_v49  }
  0x76   : > { %520 = vperm.xlu0 %2329, %v364_v50  }
  0x78   : > { %2319 = vset.pattern.permute.xlu1 %v2400_v0 }
  0x79   : > { %667 = vperm.xlu1 %2319, %v350_v49  }
  0x7a   : > { %2334 = vset.pattern.permute.xlu0 %v2400_v0 }
  0x7b   : > { %723 = vperm.xlu0 %2334, %v364_v50  }
  0x7d   : > { %671 = vperm.xlu1 %2319, %v351_v43  }
  0x81   : > { %2320 = vset.pattern.permute.xlu1 %v2401_v7 }
  0x82   : > { %465 = vperm.xlu1 %2320, %v353_v51  }
  0x86   : > { %2321 = vset.pattern.permute.xlu1 %v2400_v0 }
  0x87   : > { %679 = vperm.xlu1 %2321, %v353_v51  }
  0x8b   : > { %2322 = vset.pattern.permute.xlu1 %v2401_v7 }
  0x8c   : > { %470 = vperm.xlu1 %2322, %v354_v52  }
  0x90   : > { %2323 = vset.pattern.permute.xlu1 %v2400_v0 }
  0x91   : > { %683 = vperm.xlu1 %2323, %v354_v52  }
  0x95   : > { %687 = vperm.xlu1 %2323, %v355_v45  }
  0x98   : > { %v604_v54 = vpop.permute.xlu1 %603  ;;  %v612_v55 = vpop.permute.xlu0 %611 }
  0x99   : > { %2324 = vset.pattern.permute.xlu1 %v2401_v7  ;;  %v734_v18 = vmul.f32 %v2670_v12, %v604_v54  ;;  %v736_v32 = vmul.f32 %v2670_v12, %v612_v55 }
  0x9a   : > { %485 = vperm.xlu1 %2324, %v357_v53  }
  0x9c   : > { %v608_v56 = vpop.permute.xlu1 %607  ;;  %v2649_v57 = vpop.permute.xlu0 %627 }
  0x9d   : > { %v735_v26 = vmul.f32 %v2670_v12, %v608_v56  ;;  %v740_v56 = vmul.f32 %v2670_v12, %v2649_v57 }
  0x9e   : > { %2325 = vset.pattern.permute.xlu1 %v2400_v0 }
  0x9f   : > { %695 = vperm.xlu1 %2325, %v357_v53  }
  0xa0   : > { %v2652_v58 = vpop.permute.xlu0 %643 }
  0xa1   : > { %v386_v59 = vpop.permute.xlu1 %385 }
  0xa2   : > { %v535_v25 = vmul.f32 %v2672_v13, %v386_v59 }
  0xa3   : > { %2326 = vset.pattern.permute.xlu1 %v2401_v7 }
  0xa4   : > { %490 = vperm.xlu1 %2326, %v358_v60   ;;  %v2656_v61 = vpop.permute.xlu0 %659  ;;  %v573_v37 = vadd.f32 %v2679_v17, %v535_v25 }
  0xa6   : > { %v616_v62 = vpop.permute.xlu1 %615 }
  0xa7   : > { %v737_v30 = vmul.f32 %v2670_v12, %v616_v62 }
  0xa8   : > { %2327 = vset.pattern.permute.xlu1 %v2400_v0  ;;  %v2659_v1 = vpop.permute.xlu0 %675 }
  0xa9   : > { %699 = vperm.xlu1 %2327, %v358_v60   ;;  %v769_v41 = vadd.f32 %v737_v30, %v573_v37 }
  0xab   : > { %v391_v2 = vpop.permute.xlu1 %390  ;;  %v801_v52 = vmax.f32 %v769_v41, 0.0 }
  0xac   : > { %v2661_v4 = vpop.permute.xlu0 %691  ;;  %v536_v27 = vmul.f32 %v2672_v13, %v391_v2  ;;  %v365_v2 = vld [vmem:[%s2509_s25 + $0xf8] sm:$0xff]  ;;  %s2973_s25 = scalar_lea.vmem [#allocation2], %s1750_s26  ;;  %s2340_s26 = sshll.u32 %s2402_s23, 4  ;;  %s2341_s26 = int_to_ptr.vmem [resolvable:$false] %s2340_s26 }
  0xad   : > { %703 = vperm.xlu1 %2327, %v359_v46   ;;  %s1684_s14 = sshll.u32 %s2973_s25, 4  ;;  %s2342_s27 = scalar_lea.vmem %s2341_s26, 8192  ;;  %s3041_s14 = int_to_ptr.vmem [resolvable:$true] %s1684_s14 }
  0xae   : > { %v574_v38 = vadd.f32 %v2679_v17, %v536_v27  ;;  %s2336_s22 = scalar_lea.vmem %s3041_s14, 4096  ;;  %p2343_p0 = scmp.lt.s32.totalorder %s3041_s14, %s2341_s26 }
  0xaf   : > { %p2337_p11 = scmp.ne.s32.totalorder %s3041_s14, %s2336_s22  ;;  %p2344_p1 = scmp.lt.s32.totalorder %s2342_s27, %s2336_s22 }
  0xb0   : > { %v620_v9 = vpop.permute.xlu1 %619  ;;  %v2664_v10 = vpop.permute.xlu0 %707 }
  0xb1   : > { %2328 = vset.pattern.permute.xlu1 %v2401_v7  ;;  %v738_v33 = vmul.f32 %v2670_v12, %v620_v9  ;;  %p2338_p12 = pnand %p2337_p11, %p2493_p5  ;;  %p2345_p2 = por %p2344_p1, %p2343_p0 }
  0xb2   : > { %505 = vperm.xlu1 %2328, %v361_v5  }
  0xb3   : > { %v770_v43 = vadd.f32 %v738_v33, %v574_v38  ;;  %p2339_p13 = pneg %p2338_p12 }
  0xb4   : > { %v624_v14 = vpop.permute.xlu1 %623 }
  0xb5   : > { %v371_v15 = vpop.permute.xlu0 %370  ;;  %v739_v49 = vmul.f32 %v2670_v12, %v624_v14  ;;  %v802_v59 = vmax.f32 %v770_v43, 0.0  ;;  %p2346_p3 = pnand %p2345_p2, %p2339_p13 }
  0xb6   : > { %v532_v16 = vmul.f32 %v2672_v13, %v371_v15  ;;  %2330 = vset.pattern.permute.xlu1 %v2400_v0 }
  0xb7   : > { %711 = vperm.xlu1 %2330, %v361_v5  }
  0xb8   : > { %v570_v19 = vadd.f32 %v2679_v17, %v532_v16 }
  0xb9   : > { %v376_v20 = vpop.permute.xlu0 %375  ;;  %v406_v21 = vpop.permute.xlu1 %405 }
  0xba   : > { %v533_v23 = vmul.f32 %v2672_v13, %v376_v20  ;;  %v766_v24 = vadd.f32 %v734_v18, %v570_v19  ;;  %v539_v46 = vmul.f32 %v2672_v13, %v406_v21 }
  0xbb   : > { %2331 = vset.pattern.permute.xlu1 %v2401_v7 }
  0xbc   : > { %v571_v28 = vadd.f32 %v2679_v17, %v533_v23  ;;  %510 = vperm.xlu1 %2331, %v362_v22   ;;  %v798_v29 = vmax.f32 %v766_v24, 0.0  ;;  %v577_v63 = vadd.f32 %v2679_v17, %v539_v46  ;;  %v744_v24 = vmul.f32 %v2670_v12, %v2652_v58  ;;  %v1110_v58 = vld [vmem:[%s3094_s5] sm:$0xff] }
  0xbd   : > { %v381_v31 = vpop.permute.xlu0 %380 }
  0xbe   : > { %v534_v34 = vmul.f32 %v2672_v13, %v381_v31  ;;  %1939 = vmatprep.mubr.f32.mxu0 %v798_v29  ;;  %v632_v35 = vpop.permute.xlu1 %631  ;;  %v767_v36 = vadd.f32 %v735_v26, %v571_v28 }
  0xbf   : > { %v741_v53 = vmul.f32 %v2670_v12, %v632_v35 }
  0xc0   : > { %v572_v39 = vadd.f32 %v2679_v17, %v534_v34  ;;  %2332 = vset.pattern.permute.xlu1 %v2400_v0  ;;  %v799_v40 = vmax.f32 %v767_v36, 0.0 }
  0xc1   : > { %v396_v42 = vpop.permute.xlu0 %395  ;;  %715 = vperm.xlu1 %2332, %v362_v22   ;;  %v773_v8 = vadd.f32 %v741_v53, %v577_v63 }
  0xc2   : > { %v537_v44 = vmul.f32 %v2672_v13, %v396_v42  ;;  %1940 = vmatmul.mubr.f32.vlgmr.msra.gmra.mrb[0].mxu0 %v799_v40  ;;  %v768_v45 = vadd.f32 %v736_v32, %v572_v39 }
  0xc3   : > { %v411_v47 = vpop.permute.xlu1 %410  ;;  %v805_v20 = vmax.f32 %v773_v8, 0.0 }
  0xc4   : > { %v575_v50 = vadd.f32 %v2679_v17, %v537_v44  ;;  %v800_v51 = vmax.f32 %v768_v45, 0.0  ;;  %v540_v54 = vmul.f32 %v2672_v13, %v411_v47  ;;  %v748_v44 = vmul.f32 %v2670_v12, %v2656_v61 }
  0xc5   : > { %v401_v55 = vpop.permute.xlu0 %400  ;;  %719 = vperm.xlu1 %2332, %v2633_v48  }
  0xc6   : > { %v538_v60 = vmul.f32 %v2672_v13, %v401_v55  ;;  %1942 = vmatprep.mubr.f32.mxu0 %v800_v51  ;;  %v771_v62 = vadd.f32 %v739_v49, %v575_v50  ;;  %v578_v48 = vadd.f32 %v2679_v17, %v540_v54 }
  0xc7   : > { %1943 = vmatmul.mubr.f32.gmra.mrb[2].mxu0 %v801_v52 }
  0xc8   : > { %v576_v3 = vadd.f32 %v2679_v17, %v538_v60  ;;  %1945 = vmatprep.mubr.f32.mxu0 %v802_v59  ;;  %v636_v5 = vpop.permute.xlu1 %635  ;;  %v803_v6 = vmax.f32 %v771_v62, 0.0 }
  0xc9   : > { %v742_v9 = vmul.f32 %v2670_v12, %v636_v5  ;;  %v416_v57 = vpop.permute.xlu0 %415  ;;  %2333 = vset.pattern.permute.xlu1 %v2401_v7 }
  0xca   : > { %v541_v11 = vmul.f32 %v2672_v13, %v416_v57  ;;  %525 = vperm.xlu1 %2333, %v365_v2   ;;  %v772_v14 = vadd.f32 %v740_v56, %v576_v3 }
  0xcb   : > { %v774_v15 = vadd.f32 %v742_v9, %v578_v48  ;;  %1946 = vmatmul.mubr.f32.gmra.mrb[4].mxu0 %v803_v6 }
  0xcc   : > { %v579_v16 = vadd.f32 %v2679_v17, %v541_v11  ;;  %v640_v18 = vpop.permute.xlu1 %639  ;;  %v804_v19 = vmax.f32 %v772_v14, 0.0 }
  0xcd   : > { %v806_v21 = vmax.f32 %v774_v15, 0.0  ;;  %v743_v22 = vmul.f32 %v2670_v12, %v640_v18  ;;  %v421_v23 = vpop.permute.xlu0 %420 }
  0xce   : > { %v542_v7 = vmul.f32 %v2672_v13, %v421_v23  ;;  %2335 = vset.pattern.permute.xlu1 %v2400_v0  ;;  %1948 = vmatprep.mubr.f32.mxu0 %v804_v19  ;;  %v1111_v0 = vld [vmem:[%s3094_s5 + $0x8] sm:$0xff]  ;;  %v752_v19 = vmul.f32 %v2670_v12, %v2659_v1 }
  0xcf   : > { %v775_v25 = vadd.f32 %v743_v22, %v579_v16  ;;  %727 = vperm.xlu1 %2335, %v365_v2   ;;  %1949 = vmatmul.mubr.f32.gmra.mrb[6].mxu0 %v805_v20  ;;  %v2729_v34 = vpack.c.bf16 %v1111_v0, %v1110_v58  ;;  %v1115_v58 = vld [vmem:[%s3094_s5 + $0x28] sm:$0xff] }
  0xd0   : > { %v580_v26 = vadd.f32 %v2679_v17, %v542_v7  ;;  %1951 = vmatprep.mubr.f32.mxu0 %v806_v21 }
  0xd1   : > { %v807_v27 = vmax.f32 %v775_v25, 0.0  ;;  %v426_v28 = vpop.permute.xlu1 %425  ;;  %v436_v32 = vpop.permute.xlu0 %435  ;;  %2180 = vmatprep.subr.bf16.mxu1 %v2729_v34 }
  0xd2   : > { %v776_v29 = vadd.f32 %v744_v24, %v580_v26  ;;  %v543_v30 = vmul.f32 %v2672_v13, %v426_v28  ;;  %v545_v43 = vmul.f32 %v2672_v13, %v436_v32  ;;  %v1112_v26 = vld [vmem:[%s3094_s5 + $0x10] sm:$0xff]  ;;  %v1114_v32 = vld [vmem:[%s3094_s5 + $0x20] sm:$0xff] }
  0xd3   : > { %1952 = vmatmul.mubr.f32.gmra.mrb[8].mxu0 %v807_v27  ;;  %v1113_v27 = vld [vmem:[%s3094_s5 + $0x18] sm:$0xff] }
  0xd4   : > { %v808_v31 = vmax.f32 %v776_v29, 0.0  ;;  %v581_v35 = vadd.f32 %v2679_v17, %v543_v30  ;;  %v583_v50 = vadd.f32 %v2679_v17, %v545_v43  ;;  %v2183_v30 = vpack.c.bf16 %v1113_v27, %v1112_v26  ;;  %v1119_v43 = vld [vmem:[%s3094_s5 + $0x48] sm:$0xff] }
  0xd5   : > { %v441_v38 = vpop.permute.xlu0 %440 }
  0xd6   : > { %v648_v33 = vpop.permute.xlu1 %647  ;;  %1954 = vmatprep.mubr.f32.mxu0 %v808_v31  ;;  %v546_v41 = vmul.f32 %v2672_v13, %v441_v38 }
  0xd7   : > { %v745_v36 = vmul.f32 %v2670_v12, %v648_v33  ;;  %v2187_v33 = vpack.c.bf16 %v1115_v58, %v1114_v32 }
  0xd8   : > { %v584_v45 = vadd.f32 %v2679_v17, %v546_v41 }
  0xd9   : > { %v777_v37 = vadd.f32 %v745_v36, %v581_v35  ;;  %v456_v2 = vpop.permute.xlu0 %455  ;;  %v1116_v36 = vld [vmem:[%s3094_s5 + $0x30] sm:$0xff] }
  0xda   : > { %v780_v53 = vadd.f32 %v748_v44, %v584_v45  ;;  %v549_v14 = vmul.f32 %v2672_v13, %v456_v2 }
  0xdb   : > { %v809_v39 = vmax.f32 %v777_v37, 0.0  ;;  %v431_v40 = vpop.permute.xlu1 %430  ;;  %v1117_v37 = vld [vmem:[%s3094_s5 + $0x38] sm:$0xff] }
  0xdc   : > { %v544_v42 = vmul.f32 %v2672_v13, %v431_v40  ;;  %v812_v59 = vmax.f32 %v780_v53, 0.0  ;;  %v587_v21 = vadd.f32 %v2679_v17, %v549_v14 }
  0xdd   : > { %1955 = vmatmul.mubr.f32.gmra.mrb[10].mxu0 %v809_v39  ;;  %v461_v9 = vpop.permute.xlu0 %460 }
  0xde   : > { %v582_v47 = vadd.f32 %v2679_v17, %v544_v42  ;;  %v550_v11 = vmul.f32 %v2672_v13, %v461_v9  ;;  %v1118_v42 = vld [vmem:[%s3094_s5 + $0x40] sm:$0xff]  ;;  %v1124_v9 = vld [vmem:[%s3094_s5 + $0x70] sm:$0xff] }
  0xe0   : > { %v652_v46 = vpop.permute.xlu1 %651  ;;  %v588_v20 = vadd.f32 %v2679_v17, %v550_v11 }
  0xe1   : > { %v746_v49 = vmul.f32 %v2670_v12, %v652_v46  ;;  %v476_v38 = vpop.permute.xlu0 %475 }
  0xe2   : > { %v784_v25 = vadd.f32 %v752_v19, %v588_v20 }
  0xe3   : > { %v778_v51 = vadd.f32 %v746_v49, %v582_v47  ;;  %v2195_v49 = vpack.c.bf16 %v1119_v43, %v1118_v42 }
  0xe4   : > { %v656_v52 = vpop.permute.xlu1 %655  ;;  %v816_v31 = vmax.f32 %v784_v25, 0.0 }
  0xe5   : > { %v810_v54 = vmax.f32 %v778_v51, 0.0  ;;  %v747_v55 = vmul.f32 %v2670_v12, %v656_v52  ;;  %v481_v46 = vpop.permute.xlu0 %480  ;;  %v1120_v51 = vld [vmem:[%s3094_s5 + $0x50] sm:$0xff]  ;;  %v1121_v52 = vld [vmem:[%s3094_s5 + $0x58] sm:$0xff] }
  0xe7   : > { %v779_v56 = vadd.f32 %v747_v55, %v583_v50  ;;  %1957 = vmatprep.mubr.f32.mxu0 %v810_v54  ;;  %v554_v50 = vmul.f32 %v2672_v13, %v481_v46  ;;  %v553_v54 = vmul.f32 %v2672_v13, %v476_v38 }
  0xe9   : > { %v811_v60 = vmax.f32 %v779_v56, 0.0  ;;  %v446_v61 = vpop.permute.xlu1 %445  ;;  %v496_v20 = vpop.permute.xlu0 %495 }
  0xea   : > { %v547_v62 = vmul.f32 %v2672_v13, %v446_v61  ;;  %v592_v61 = vadd.f32 %v2679_v17, %v554_v50 }
  0xeb   : > { %1958 = vmatmul.mubr.f32.gmra.mrb[12].mxu0 %v811_v60  ;;  %v756_v60 = vmul.f32 %v2670_v12, %v2661_v4 }
  0xec   : > { %1960 = vmatprep.mubr.f32.mxu0 %v812_v59  ;;  %v585_v3 = vadd.f32 %v2679_v17, %v547_v62  ;;  %v2199_v59 = vpack.c.bf16 %v1121_v52, %v1120_v51  ;;  %v1122_v62 = vld [vmem:[%s3094_s5 + $0x60] sm:$0xff] }
  0xee   : > { %v664_v63 = vpop.permute.xlu1 %663 }
  0xef   : > { %v749_v5 = vmul.f32 %v2670_v12, %v664_v63  ;;  %v1123_v63 = vld [vmem:[%s3094_s5 + $0x68] sm:$0xff] }
  0xf0   : > { %v2203_v4 = vpack.c.bf16 %v1123_v63, %v1122_v62 }
  0xf1   : > { %v781_v6 = vadd.f32 %v749_v5, %v585_v3  ;;  %v591_v5 = vadd.f32 %v2679_v17, %v553_v54 }
  0xf3   : > { %v813_v8 = vmax.f32 %v781_v6, 0.0  ;;  %v451_v48 = vpop.permute.xlu1 %450 }
  0xf4   : > { %v548_v57 = vmul.f32 %v2672_v13, %v451_v48  ;;  %v788_v48 = vadd.f32 %v756_v60, %v592_v61 }
  0xf5   : > { %1961 = vmatmul.mubr.f32.gmra.mrb[14].mxu0 %v813_v8 }
  0xf6   : > { %v586_v18 = vadd.f32 %v2679_v17, %v548_v57  ;;  %v1125_v57 = vld [vmem:[%s3094_s5 + $0x78] sm:$0xff] }
  0xf8   : > { %v668_v15 = vpop.permute.xlu1 %667 }
  0xf9   : > { %v750_v16 = vmul.f32 %v2670_v12, %v668_v15 }
  0xfb   : > { %v782_v22 = vadd.f32 %v750_v16, %v586_v18  ;;  %v2207_v16 = vpack.c.bf16 %v1125_v57, %v1124_v9  ;;  %v820_v18 = vmax.f32 %v788_v48, 0.0 }
  0xfc   : > { %v672_v23 = vpop.permute.xlu1 %671 }
  0xfd   : > { %v751_v24 = vmul.f32 %v2670_v12, %v672_v23  ;;  %v814_v7 = vmax.f32 %v782_v22, 0.0 }
  0xff   : > { %v783_v28 = vadd.f32 %v751_v24, %v587_v21  ;;  %1963 = vmatprep.mubr.f32.mxu1 %v814_v7  ;;  %v501_v7 = vpop.permute.xlu0 %500 }
 0x101   : > { %v815_v1 = vmax.f32 %v783_v28, 0.0  ;;  %v466_v29 = vpop.permute.xlu1 %465  ;;  %v558_v28 = vmul.f32 %v2672_v13, %v501_v7 }
 0x102   : > { %v551_v0 = vmul.f32 %v2672_v13, %v466_v29  ;;  %v557_v29 = vmul.f32 %v2672_v13, %v496_v20 }
 0x103   : > { %1964 = vmatmul.mubr.f32.vlgmr.msra.gmra.mrb[0].mxu1 %v815_v1  ;;  %v596_v32 = vadd.f32 %v2679_v17, %v558_v28  ;;  %v516_v42 = vpop.permute.xlu0 %515 }
 0x104   : > { %1966 = vmatprep.mubr.f32.mxu1 %v816_v31  ;;  %2182 = vmatpush3.bf16.msra.mxu1 %v2729_v34  ;;  %v589_v39 = vadd.f32 %v2679_v17, %v551_v0  ;;  %v2191_v34 = vpack.c.bf16 %v1117_v37, %v1116_v36  ;;  %v760_v0 = vmul.f32 %v2670_v12, %v2664_v10 }
 0x105   : > { %2184 = vmatprep.subr.bf16.mxu1 %v2183_v30 }
 0x106   : > { %v680_v35 = vpop.permute.xlu1 %679  ;;  %v792_v38 = vadd.f32 %v760_v0, %v596_v32 }
 0x107   : > { %v753_v40 = vmul.f32 %v2670_v12, %v680_v35  ;;  %v595_v35 = vadd.f32 %v2679_v17, %v557_v29  ;;  %v521_v46 = vpop.permute.xlu0 %520 }
 0x108   : > { %2186 = vmatpush3.bf16.msra.mxu1 %v2183_v30  ;;  %v562_v52 = vmul.f32 %v2672_v13, %v521_v46 }
 0x109   : > { %v785_v41 = vadd.f32 %v753_v40, %v589_v39  ;;  %2188 = vmatprep.subr.bf16.mxu1 %v2187_v33 }
 0x10a   : > { %v600_v60 = vadd.f32 %v2679_v17, %v562_v52  ;;  %v1394_v52 = vld [vmem:[%s3096_s7 + $0x20] sm:$0xff] }
 0x10b   : > { %v817_v44 = vmax.f32 %v785_v41, 0.0  ;;  %v471_v45 = vpop.permute.xlu1 %470 }
 0x10c   : > { %2190 = vmatpush3.bf16.msra.mxu1 %v2187_v33  ;;  %v552_v47 = vmul.f32 %v2672_v13, %v471_v45 }
 0x10d   : > { %1967 = vmatmul.mubr.f32.gmra.mrb[2].mxu1 %v817_v44  ;;  %2192 = vmatprep.subr.bf16.mxu1 %v2191_v34 }
 0x10e   : > { %v590_v55 = vadd.f32 %v2679_v17, %v552_v47 }
 0x110   : > { %v684_v53 = vpop.permute.xlu1 %683  ;;  %2194 = vmatpush3.bf16.msra.mxu1 %v2191_v34  ;;  %v824_v34 = vmax.f32 %v792_v38, 0.0 }
 0x111   : > { %v754_v56 = vmul.f32 %v2670_v12, %v684_v53  ;;  %2196 = vmatprep.subr.bf16.mxu1 %v2195_v49  ;;  %v724_v53 = vpop.permute.xlu0 %723 }
 0x112   : > { %v764_v61 = vmul.f32 %v2670_v12, %v724_v53  ;;  %v1395_v53 = vld [vmem:[%s3096_s7 + $0x28] sm:$0xff] }
 0x113   : > { %v786_v2 = vadd.f32 %v754_v56, %v590_v55  ;;  %v561_v55 = vmul.f32 %v2672_v13, %v516_v42 }
 0x114   : > { %v688_v3 = vpop.permute.xlu1 %687  ;;  %2198 = vmatpush3.bf16.msra.mxu1 %v2195_v49 }
 0x115   : > { %v818_v6 = vmax.f32 %v786_v2, 0.0  ;;  %v755_v8 = vmul.f32 %v2670_v12, %v688_v3  ;;  %2200 = vmatprep.subr.bf16.mxu1 %v2199_v59  ;;  %v599_v2 = vadd.f32 %v2679_v17, %v561_v55 }
 0x117   : > { %v787_v11 = vadd.f32 %v755_v8, %v591_v5  ;;  %1969 = vmatprep.mubr.f32.mxu1 %v818_v6  ;;  %v796_v6 = vadd.f32 %v764_v61, %v600_v60  ;;  %v1396_v60 = vld [vmem:[%s3096_s7 + $0x30] sm:$0xff]  ;;  %v1397_v61 = vld [vmem:[%s3096_s7 + $0x38] sm:$0xff] }
 0x118   : > { %2202 = vmatpush3.bf16.msra.mxu1 %v2199_v59 }
 0x119   : > { %v819_v14 = vmax.f32 %v787_v11, 0.0  ;;  %v486_v15 = vpop.permute.xlu1 %485  ;;  %2204 = vmatprep.subr.bf16.mxu1 %v2203_v4  ;;  %v828_v9 = vmax.f32 %v796_v6, 0.0  ;;  %v1401_v6 = vld [vmem:[%s3096_s7 + $0x58] sm:$0xff] }
 0x11a   : > { %v555_v19 = vmul.f32 %v2672_v13, %v486_v15 }
 0x11b   : > { %1970 = vmatmul.mubr.f32.gmra.mrb[4].mxu1 %v819_v14 }
 0x11c   : > { %1972 = vmatprep.mubr.f32.mxu1 %v820_v18  ;;  %2206 = vmatpush3.bf16.msra.mxu1 %v2203_v4  ;;  %v593_v22 = vadd.f32 %v2679_v17, %v555_v19  ;;  %v2844_v19 = vld [vmem:[%s3093_s4] ss:$0 sm:$0xff] }
 0x11d   : > { %2208 = vmatprep.subr.bf16.mxu1 %v2207_v16 }
 0x11e   : > { %v696_v21 = vpop.permute.xlu1 %695 }
 0x11f   : > { %v757_v23 = vmul.f32 %v2670_v12, %v696_v21 }
 0x120   : > { %2210 = vmatpush3.bf16.msra.mxu1 %v2207_v16 }
 0x121   : > { %v789_v24 = vadd.f32 %v757_v23, %v593_v22 }
 0x123   : > { %v821_v25 = vmax.f32 %v789_v24, 0.0  ;;  %v491_v26 = vpop.permute.xlu1 %490 }
 0x124   : > { %v556_v27 = vmul.f32 %v2672_v13, %v491_v26 }
 0x125   : > { %1973 = vmatmul.mubr.f32.gmra.mrb[6].mxu1 %v821_v25 }
 0x126   : > { %v594_v30 = vadd.f32 %v2679_v17, %v556_v27 }
 0x128   : > { %v700_v1 = vpop.permute.xlu1 %699 }
 0x129   : > { %v758_v31 = vmul.f32 %v2670_v12, %v700_v1 }
 0x12b   : > { %v790_v58 = vadd.f32 %v758_v31, %v594_v30 }
 0x12c   : > { %v704_v33 = vpop.permute.xlu1 %703 }
 0x12d   : > { %v822_v36 = vmax.f32 %v790_v58, 0.0  ;;  %v759_v37 = vmul.f32 %v2670_v12, %v704_v33 }
 0x12f   : > { %v791_v39 = vadd.f32 %v759_v37, %v595_v35  ;;  %1975 = vmatprep.mubr.f32.mxu1 %v822_v36 }
 0x131   : > { %v823_v40 = vmax.f32 %v791_v39, 0.0  ;;  %v506_v41 = vpop.permute.xlu1 %505 }
 0x132   : > { %v559_v43 = vmul.f32 %v2672_v13, %v506_v41 }
 0x133   : > { %1976 = vmatmul.mubr.f32.gmra.mrb[8].mxu1 %v823_v40 }
 0x134   : > { %1978 = vmatprep.mubr.f32.mxu1 %v824_v34  ;;  %v597_v10 = vadd.f32 %v2679_v17, %v559_v43  ;;  %v1390_v43 = vld [vmem:[%s3096_s7] sm:$0xff] }
 0x136   : > { %v712_v44 = vpop.permute.xlu1 %711 }
 0x137   : > { %v761_v45 = vmul.f32 %v2670_v12, %v712_v44  ;;  %v1391_v44 = vld [vmem:[%s3096_s7 + $0x8] sm:$0xff] }
 0x138   : > { %v2211_v46 = vpack.c.bf16 %v1391_v44, %v1390_v43 }
 0x139   : > { %v793_v47 = vadd.f32 %v761_v45, %v597_v10  ;;  %v1392_v10 = vld [vmem:[%s3096_s7 + $0x10] sm:$0xff] }
 0x13a   : > { %2212 = vmatprep.subr.bf16.mxu0 %v2211_v46 }
 0x13b   : > { %v825_v49 = vmax.f32 %v793_v47, 0.0  ;;  %v511_v50 = vpop.permute.xlu1 %510  ;;  %v1393_v47 = vld [vmem:[%s3096_s7 + $0x18] sm:$0xff]  ;;  %2214 = vmatpush3.bf16.msra.mxu0 %v2211_v46 }
 0x13c   : > { %v560_v51 = vmul.f32 %v2672_v13, %v511_v50 }
 0x13d   : > { %1979 = vmatmul.mubr.f32.gmra.mrb[10].mxu1 %v825_v49 }
 0x13e   : > { %v598_v56 = vadd.f32 %v2679_v17, %v560_v51  ;;  %v2215_v51 = vpack.c.bf16 %v1393_v47, %v1392_v10 }
 0x140   : > { %v716_v54 = vpop.permute.xlu1 %715  ;;  %2216 = vmatprep.subr.bf16.mxu0 %v2215_v51 }
 0x141   : > { %v762_v59 = vmul.f32 %v2670_v12, %v716_v54  ;;  %2218 = vmatpush3.bf16.msra.mxu0 %v2215_v51 }
 0x143   : > { %v794_v62 = vadd.f32 %v762_v59, %v598_v56  ;;  %v2219_v56 = vpack.c.bf16 %v1395_v53, %v1394_v52 }
 0x144   : > { %v720_v63 = vpop.permute.xlu1 %719 }
 0x145   : > { %v826_v3 = vmax.f32 %v794_v62, 0.0  ;;  %v763_v5 = vmul.f32 %v2670_v12, %v720_v63  ;;  %2220 = vmatprep.subr.bf16.mxu0 %v2219_v56  ;;  %v2223_v62 = vpack.c.bf16 %v1397_v61, %v1396_v60  ;;  %v1398_v63 = vld [vmem:[%s3096_s7 + $0x40] sm:$0xff] }
 0x146   : > { %2222 = vmatpush3.bf16.msra.mxu0 %v2219_v56 }
 0x147   : > { %v795_v8 = vadd.f32 %v763_v5, %v599_v2  ;;  %1981 = vmatprep.mubr.f32.mxu1 %v826_v3  ;;  %v1399_v2 = vld [vmem:[%s3096_s7 + $0x48] sm:$0xff]  ;;  %2224 = vmatprep.subr.bf16.mxu0 %v2223_v62  ;;  %v1400_v5 = vld [vmem:[%s3096_s7 + $0x50] sm:$0xff] }
 0x148   : > { %v2227_v3 = vpack.c.bf16 %v1399_v2, %v1398_v63 }
 0x149   : > { %v827_v4 = vmax.f32 %v795_v8, 0.0  ;;  %v526_v48 = vpop.permute.xlu1 %525 }
 0x14a   : > { %v563_v57 = vmul.f32 %v2672_v13, %v526_v48  ;;  %2226 = vmatpush3.bf16.msra.mxu0 %v2223_v62 }
 0x14b   : > { %1982 = vmatmul.mubr.f32.gmra.mrb[12].mxu1 %v827_v4  ;;  %2228 = vmatprep.subr.bf16.mxu0 %v2227_v3 }
 0x14c   : > { %1984 = vmatprep.mubr.f32.mxu1 %v828_v9  ;;  %v601_v14 = vadd.f32 %v2679_v17, %v563_v57  ;;  %v2231_v57 = vpack.c.bf16 %v1401_v6, %v1400_v5 }
 0x14e   : > { %v728_v11 = vpop.permute.xlu1 %727  ;;  %2230 = vmatpush3.bf16.msra.mxu0 %v2227_v3 }
 0x14f   : > { %v765_v15 = vmul.f32 %v2670_v12, %v728_v11  ;;  %v1402_v11 = vld [vmem:[%s3096_s7 + $0x60] sm:$0xff]  ;;  %2232 = vmatprep.subr.bf16.mxu0 %v2231_v57 }
 0x151   : > { %v797_v16 = vadd.f32 %v765_v15, %v601_v14  ;;  %v1403_v14 = vld [vmem:[%s3096_s7 + $0x68] sm:$0xff] }
 0x152   : > { %2234 = vmatpush3.bf16.msra.mxu0 %v2231_v57  ;;  %v2929_v57 = vld [vmem:[%s3095_s6] ss:$0 sm:$0xff] }
 0x153   : > { %v829_v18 = vmax.f32 %v797_v16, 0.0 }
 0x155   : > { %1985 = vmatmul.mubr.f32.gmra.mrb[14].mxu1 %v829_v18  ;;  %v2235_v18 = vpack.c.bf16 %v1403_v14, %v1402_v11 }
 0x157   : > { %2236 = vmatprep.subr.bf16.mxu0 %v2235_v18 }
 0x158   : > { %2238 = vmatpush3.bf16.msra.mxu0 %v2235_v18 }
 0x195   : > { %v1941_v20 = vpop.f32.mrb[0].mxu0 }
 0x196   : > { %v925_v21 = vadd.f32 %v1941_v20, %v2844_v19  ;;  %v919_v22 = vpop.f32.mrb[1].mxu0 }
 0x197   : > { %v920_v13 = vadd.f32 %v2844_v19, %v919_v22 }
 0x198   : > { %v1079_v24 = vmax.f32 %v925_v21, 0.0 }
 0x199   : > { %v1078_v23 = vmax.f32 %v920_v13, 0.0 }
 0x19a   : > { %v1944_v7 = vpop.f32.mrb[2].mxu0 }
 0x19b   : > { %v935_v17 = vadd.f32 %v1944_v7, %v2844_v19  ;;  %v929_v12 = vpop.f32.mrb[3].mxu0  ;;  %2019 = vmatprep.mubr.f32.mxu1 %v1078_v23 }
 0x19c   : > { %v930_v25 = vadd.f32 %v2844_v19, %v929_v12  ;;  %2020 = vmatmul.mubr.f32.vlgmr.msra.gmra.mrb[16].mxu1 %v1079_v24 }
 0x19d   : > { %v1081_v28 = vmax.f32 %v935_v17, 0.0 }
 0x19e   : > { %v1080_v26 = vmax.f32 %v930_v25, 0.0  ;;  %v1947_v27 = vpop.f32.mrb[4].mxu0 }
 0x19f   : > { %v945_v1 = vadd.f32 %v1947_v27, %v2844_v19  ;;  %v939_v29 = vpop.f32.mrb[5].mxu0 }
 0x1a0   : > { %v940_v30 = vadd.f32 %v2844_v19, %v939_v29  ;;  %2022 = vmatprep.mubr.f32.mxu1 %v1080_v26 }
 0x1a1   : > { %2023 = vmatmul.mubr.f32.gmra.mrb[18].mxu1 %v1081_v28  ;;  %v1083_v58 = vmax.f32 %v945_v1, 0.0 }
 0x1a2   : > { %v1082_v31 = vmax.f32 %v940_v30, 0.0  ;;  %v1950_v32 = vpop.f32.mrb[6].mxu0 }
 0x1a3   : > { %v955_v0 = vadd.f32 %v1950_v32, %v2844_v19  ;;  %v949_v33 = vpop.f32.mrb[7].mxu0 }
 0x1a4   : > { %v950_v35 = vadd.f32 %v2844_v19, %v949_v33  ;;  %2025 = vmatprep.mubr.f32.mxu1 %v1082_v31 }
 0x1a5   : > { %2026 = vmatmul.mubr.f32.gmra.mrb[20].mxu1 %v1083_v58  ;;  %v1085_v38 = vmax.f32 %v955_v0, 0.0 }
 0x1a6   : > { %v1084_v36 = vmax.f32 %v950_v35, 0.0  ;;  %v1953_v37 = vpop.f32.mrb[8].mxu0  ;;  %v1404_v35 = vld [vmem:[%s3096_s7 + $0x70] sm:$0xff] }
 0x1a7   : > { %v965_v39 = vadd.f32 %v1953_v37, %v2844_v19  ;;  %v959_v40 = vpop.f32.mrb[9].mxu0 }
 0x1a8   : > { %v960_v41 = vadd.f32 %v2844_v19, %v959_v40  ;;  %2028 = vmatprep.mubr.f32.mxu1 %v1084_v36  ;;  %v1405_v36 = vld [vmem:[%s3096_s7 + $0x78] sm:$0xff] }
 0x1a9   : > { %2029 = vmatmul.mubr.f32.gmra.mrb[22].mxu1 %v1085_v38  ;;  %v1087_v42 = vmax.f32 %v965_v39, 0.0  ;;  %v2239_v38 = vpack.c.bf16 %v1405_v36, %v1404_v35 }
 0x1aa   : > { %v1086_v34 = vmax.f32 %v960_v41, 0.0 }
 0x1ab   : > { %2240 = vmatprep.subr.bf16.mxu0 %v2239_v38 }
 0x1ac   : > { %2031 = vmatprep.mubr.f32.mxu1 %v1086_v34  ;;  %2242 = vmatpush3.bf16.msra.mxu0 %v2239_v38 }
 0x1ad   : > { %2032 = vmatmul.mubr.f32.gmra.mrb[24].mxu1 %v1087_v42 }
 0x1b0   : > { %v1956_v45 = vpop.f32.mrb[10].mxu0 }
 0x1b1   : > { %v975_v49 = vadd.f32 %v1956_v45, %v2844_v19  ;;  %v969_v50 = vpop.f32.mrb[11].mxu0 }
 0x1b2   : > { %v970_v54 = vadd.f32 %v2844_v19, %v969_v50 }
 0x1b3   : > { %v1089_v59 = vmax.f32 %v975_v49, 0.0 }
 0x1b4   : > { %v1088_v55 = vmax.f32 %v970_v54, 0.0 }
 0x1b6   : > { %2034 = vmatprep.mubr.f32.mxu1 %v1088_v55 }
 0x1b7   : > { %2035 = vmatmul.mubr.f32.gmra.mrb[26].mxu1 %v1089_v59 }
 0x1be   : > { %v1959_v8 = vpop.f32.mrb[12].mxu0 }
 0x1bf   : > { %v985_v4 = vadd.f32 %v1959_v8, %v2844_v19  ;;  %v979_v48 = vpop.f32.mrb[13].mxu0 }
 0x1c0   : > { %v980_v9 = vadd.f32 %v2844_v19, %v979_v48 }
 0x1c1   : > { %v1091_v16 = vmax.f32 %v985_v4, 0.0 }
 0x1c2   : > { %v1090_v15 = vmax.f32 %v980_v9, 0.0 }
 0x1c4   : > { %2037 = vmatprep.mubr.f32.mxu1 %v1090_v15 }
 0x1c5   : > { %2038 = vmatmul.mubr.f32.gmra.mrb[28].mxu1 %v1091_v16 }
 0x1c8   : > { %v1962_v20 = vpop.f32.mrb[14].mxu0 }
 0x1c9   : > { %v995_v21 = vadd.f32 %v1962_v20, %v2844_v19  ;;  %v989_v22 = vpop.f32.mrb[15].mxu0 }
 0x1ca   : > { %v990_v13 = vadd.f32 %v2844_v19, %v989_v22 }
 0x1cb   : > { %v1093_v24 = vmax.f32 %v995_v21, 0.0 }
 0x1cc   : > { %v1092_v23 = vmax.f32 %v990_v13, 0.0 }
 0x1ce   : > { %2040 = vmatprep.mubr.f32.mxu1 %v1092_v23 }
 0x1cf   : > { %2041 = vmatmul.mubr.f32.gmra.mrb[30].mxu1 %v1093_v24 }
 0x1d6   : > { %v1965_v7 = vpop.f32.mrb[0].mxu1 }
 0x1d7   : > { %v1005_v17 = vadd.f32 %v1965_v7, %v2844_v19  ;;  %v999_v12 = vpop.f32.mrb[1].mxu1 }
 0x1d8   : > { %v1000_v25 = vadd.f32 %v2844_v19, %v999_v12 }
 0x1d9   : > { %v1095_v27 = vmax.f32 %v1005_v17, 0.0 }
 0x1da   : > { %v1094_v26 = vmax.f32 %v1000_v25, 0.0 }
 0x1dc   : > { %2043 = vmatprep.mubr.f32.mxu1 %v1094_v26 }
 0x1dd   : > { %2044 = vmatmul.mubr.f32.gmra.mrb[32].mxu1 %v1095_v27 }
 0x1e0   : > { %v1968_v28 = vpop.f32.mrb[2].mxu1 }
 0x1e1   : > { %v1015_v1 = vadd.f32 %v1968_v28, %v2844_v19  ;;  %v1009_v29 = vpop.f32.mrb[3].mxu1 }
 0x1e2   : > { %v1010_v30 = vadd.f32 %v2844_v19, %v1009_v29 }
 0x1e3   : > { %v1097_v32 = vmax.f32 %v1015_v1, 0.0 }
 0x1e4   : > { %v1096_v31 = vmax.f32 %v1010_v30, 0.0 }
 0x1e6   : > { %2046 = vmatprep.mubr.f32.mxu1 %v1096_v31 }
 0x1e7   : > { %2047 = vmatmul.mubr.f32.gmra.mrb[34].mxu1 %v1097_v32 }
 0x1ee   : > { %v1971_v58 = vpop.f32.mrb[4].mxu1 }
 0x1ef   : > { %v1025_v0 = vadd.f32 %v1971_v58, %v2844_v19  ;;  %v1019_v33 = vpop.f32.mrb[5].mxu1 }
 0x1f0   : > { %v1020_v37 = vadd.f32 %v2844_v19, %v1019_v33 }
 0x1f1   : > { %v1099_v40 = vmax.f32 %v1025_v0, 0.0 }
 0x1f2   : > { %v1098_v39 = vmax.f32 %v1020_v37, 0.0 }
 0x1f4   : > { %2049 = vmatprep.mubr.f32.mxu1 %v1098_v39 }
 0x1f5   : > { %2050 = vmatmul.mubr.f32.gmra.mrb[36].mxu1 %v1099_v40 }
 0x1f8   : > { %v1974_v41 = vpop.f32.mrb[6].mxu1 }
 0x1f9   : > { %v1035_v34 = vadd.f32 %v1974_v41, %v2844_v19  ;;  %v1029_v42 = vpop.f32.mrb[7].mxu1 }
 0x1fa   : > { %v1030_v43 = vadd.f32 %v2844_v19, %v1029_v42 }
 0x1fb   : > { %v1101_v10 = vmax.f32 %v1035_v34, 0.0 }
 0x1fc   : > { %v1100_v44 = vmax.f32 %v1030_v43, 0.0 }
 0x1fe   : > { %2052 = vmatprep.mubr.f32.mxu1 %v1100_v44 }
 0x1ff   : > { %2053 = vmatmul.mubr.f32.gmra.mrb[38].mxu1 %v1101_v10 }
 0x206   : > { %v1977_v45 = vpop.f32.mrb[8].mxu1 }
 0x207   : > { %v1045_v46 = vadd.f32 %v1977_v45, %v2844_v19  ;;  %v1039_v47 = vpop.f32.mrb[9].mxu1 }
 0x208   : > { %v1040_v49 = vadd.f32 %v2844_v19, %v1039_v47 }
 0x209   : > { %v1103_v51 = vmax.f32 %v1045_v46, 0.0 }
 0x20a   : > { %v1102_v50 = vmax.f32 %v1040_v49, 0.0 }
 0x20c   : > { %2055 = vmatprep.mubr.f32.mxu1 %v1102_v50 }
 0x20d   : > { %2056 = vmatmul.mubr.f32.gmra.mrb[40].mxu1 %v1103_v51 }
 0x210   : > { %v1980_v52 = vpop.f32.mrb[10].mxu1 }
 0x211   : > { %v1055_v53 = vadd.f32 %v1980_v52, %v2844_v19  ;;  %v1049_v54 = vpop.f32.mrb[11].mxu1 }
 0x212   : > { %v1050_v55 = vadd.f32 %v2844_v19, %v1049_v54 }
 0x213   : > { %v1105_v59 = vmax.f32 %v1055_v53, 0.0 }
 0x214   : > { %v1104_v56 = vmax.f32 %v1050_v55, 0.0 }
 0x216   : > { %2058 = vmatprep.mubr.f32.mxu1 %v1104_v56 }
 0x217   : > { %2059 = vmatmul.mubr.f32.gmra.mrb[42].mxu1 %v1105_v59 }
 0x21e   : > { %v1983_v60 = vpop.f32.mrb[12].mxu1 }
 0x21f   : > { %v1065_v61 = vadd.f32 %v1983_v60, %v2844_v19  ;;  %v1059_v62 = vpop.f32.mrb[13].mxu1 }
 0x220   : > { %v1060_v63 = vadd.f32 %v2844_v19, %v1059_v62 }
 0x221   : > { %v1107_v3 = vmax.f32 %v1065_v61, 0.0 }
 0x222   : > { %v1106_v2 = vmax.f32 %v1060_v63, 0.0 }
 0x224   : > { %2061 = vmatprep.mubr.f32.mxu1 %v1106_v2 }
 0x225   : > { %2062 = vmatmul.mubr.f32.gmra.mrb[44].mxu1 %v1107_v3 }
 0x228   : > { %v1986_v5 = vpop.f32.mrb[14].mxu1 }
 0x229   : > { %v1075_v6 = vadd.f32 %v1986_v5, %v2844_v19  ;;  %v1069_v8 = vpop.f32.mrb[15].mxu1 }
 0x22a   : > { %v1070_v4 = vadd.f32 %v2844_v19, %v1069_v8 }
 0x22b   : > { %v1109_v9 = vmax.f32 %v1075_v6, 0.0 }
 0x22c   : > { %v1108_v48 = vmax.f32 %v1070_v4, 0.0 }
 0x22e   : > { %2064 = vmatprep.mubr.f32.mxu1 %v1108_v48 }
 0x22f   : > { %2065 = vmatmul.mubr.f32.gmra.mrb[46].mxu1 %v1109_v9 }
 0x26f   : > { %v2021_v11 = vpop.f32.mrb[16].mxu1 }
 0x270   : > { %v1205_v14 = vadd.f32 %v2021_v11, %v2929_v57  ;;  %v1199_v15 = vpop.f32.mrb[17].mxu1 }
 0x271   : > { %v1200_v16 = vadd.f32 %v2929_v57, %v1199_v15 }
 0x272   : > { %v1359_v20 = vmax.f32 %v1205_v14, 0.0 }
 0x273   : > { %v1358_v18 = vmax.f32 %v1200_v16, 0.0 }
 0x274   : > { %v2024_v21 = vpop.f32.mrb[18].mxu1 }
 0x275   : > { %v1215_v19 = vadd.f32 %v2024_v21, %v2929_v57  ;;  %v1209_v22 = vpop.f32.mrb[19].mxu1  ;;  %2099 = vmatprep.mubr.f32.mxu0 %v1358_v18 }
 0x276   : > { %v1210_v13 = vadd.f32 %v2929_v57, %v1209_v22  ;;  %2100 = vmatmul.mubr.f32.vlgmr.msra.gmra.mrb[16].mxu0 %v1359_v20 }
 0x277   : > { %v1361_v7 = vmax.f32 %v1215_v19, 0.0 }
 0x278   : > { %v1360_v23 = vmax.f32 %v1210_v13, 0.0  ;;  %v2027_v24 = vpop.f32.mrb[20].mxu1 }
 0x279   : > { %v1225_v17 = vadd.f32 %v2027_v24, %v2929_v57  ;;  %v1219_v12 = vpop.f32.mrb[21].mxu1 }
 0x27a   : > { %v1220_v25 = vadd.f32 %v2929_v57, %v1219_v12  ;;  %2102 = vmatprep.mubr.f32.mxu0 %v1360_v23 }
 0x27b   : > { %2103 = vmatmul.mubr.f32.gmra.mrb[18].mxu0 %v1361_v7  ;;  %v1363_v28 = vmax.f32 %v1225_v17, 0.0 }
 0x27c   : > { %v1362_v26 = vmax.f32 %v1220_v25, 0.0  ;;  %v2030_v27 = vpop.f32.mrb[22].mxu1 }
 0x27d   : > { %v1235_v1 = vadd.f32 %v2030_v27, %v2929_v57  ;;  %v1229_v29 = vpop.f32.mrb[23].mxu1 }
 0x27e   : > { %v1230_v30 = vadd.f32 %v2929_v57, %v1229_v29  ;;  %2105 = vmatprep.mubr.f32.mxu0 %v1362_v26 }
 0x27f   : > { %2106 = vmatmul.mubr.f32.gmra.mrb[20].mxu0 %v1363_v28  ;;  %v1365_v58 = vmax.f32 %v1235_v1, 0.0 }
 0x280   : > { %v1364_v31 = vmax.f32 %v1230_v30, 0.0  ;;  %v2033_v32 = vpop.f32.mrb[24].mxu1 }
 0x281   : > { %v1245_v0 = vadd.f32 %v2033_v32, %v2929_v57  ;;  %v1239_v33 = vpop.f32.mrb[25].mxu1 }
 0x282   : > { %v1240_v35 = vadd.f32 %v2929_v57, %v1239_v33  ;;  %2108 = vmatprep.mubr.f32.mxu0 %v1364_v31 }
 0x283   : > { %2109 = vmatmul.mubr.f32.gmra.mrb[22].mxu0 %v1365_v58  ;;  %v1367_v37 = vmax.f32 %v1245_v0, 0.0 }
 0x284   : > { %v1366_v36 = vmax.f32 %v1240_v35, 0.0 }
 0x286   : > { %2111 = vmatprep.mubr.f32.mxu0 %v1366_v36 }
 0x287   : > { %2112 = vmatmul.mubr.f32.gmra.mrb[24].mxu0 %v1367_v37 }
 0x28a   : > { %v2036_v38 = vpop.f32.mrb[26].mxu1 }
 0x28b   : > { %v1255_v39 = vadd.f32 %v2036_v38, %v2929_v57  ;;  %v1249_v40 = vpop.f32.mrb[27].mxu1 }
 0x28c   : > { %v1250_v41 = vadd.f32 %v2929_v57, %v1249_v40 }
 0x28d   : > { %v1369_v42 = vmax.f32 %v1255_v39, 0.0 }
 0x28e   : > { %v1368_v34 = vmax.f32 %v1250_v41, 0.0  ;;  %v2969_v41 = vld [vmem:[%s3097_s8] ss:$0 sm:$0xff] }
 0x290   : > { %2114 = vmatprep.mubr.f32.mxu0 %v1368_v34 }
 0x291   : > { %2115 = vmatmul.mubr.f32.gmra.mrb[26].mxu0 %v1369_v42 }
 0x298   : > { %v2039_v43 = vpop.f32.mrb[28].mxu1 }
 0x299   : > { %v1265_v44 = vadd.f32 %v2039_v43, %v2929_v57  ;;  %v1259_v10 = vpop.f32.mrb[29].mxu1 }
 0x29a   : > { %v1260_v45 = vadd.f32 %v2929_v57, %v1259_v10 }
 0x29b   : > { %v1371_v47 = vmax.f32 %v1265_v44, 0.0 }
 0x29c   : > { %v1370_v46 = vmax.f32 %v1260_v45, 0.0 }
 0x29e   : > { %2117 = vmatprep.mubr.f32.mxu0 %v1370_v46 }
 0x29f   : > { %2118 = vmatmul.mubr.f32.gmra.mrb[28].mxu0 %v1371_v47 }
 0x2a2   : > { %v2042_v49 = vpop.f32.mrb[30].mxu1 }
 0x2a3   : > { %v1275_v50 = vadd.f32 %v2042_v49, %v2929_v57  ;;  %v1269_v51 = vpop.f32.mrb[31].mxu1 }
 0x2a4   : > { %v1270_v52 = vadd.f32 %v2929_v57, %v1269_v51 }
 0x2a5   : > { %v1373_v54 = vmax.f32 %v1275_v50, 0.0 }
 0x2a6   : > { %v1372_v53 = vmax.f32 %v1270_v52, 0.0 }
 0x2a8   : > { %2120 = vmatprep.mubr.f32.mxu0 %v1372_v53 }
 0x2a9   : > { %2121 = vmatmul.mubr.f32.gmra.mrb[30].mxu0 %v1373_v54 }
 0x2b0   : > { %v2045_v55 = vpop.f32.mrb[32].mxu1 }
 0x2b1   : > { %v1285_v56 = vadd.f32 %v2045_v55, %v2929_v57  ;;  %v1279_v59 = vpop.f32.mrb[33].mxu1 }
 0x2b2   : > { %v1280_v60 = vadd.f32 %v2929_v57, %v1279_v59 }
 0x2b3   : > { %v1375_v62 = vmax.f32 %v1285_v56, 0.0 }
 0x2b4   : > { %v1374_v61 = vmax.f32 %v1280_v60, 0.0 }
 0x2b6   : > { %2123 = vmatprep.mubr.f32.mxu0 %v1374_v61 }
 0x2b7   : > { %2124 = vmatmul.mubr.f32.gmra.mrb[32].mxu0 %v1375_v62 }
 0x2ba   : > { %v2048_v63 = vpop.f32.mrb[34].mxu1 }
 0x2bb   : > { %v1295_v2 = vadd.f32 %v2048_v63, %v2929_v57  ;;  %v1289_v3 = vpop.f32.mrb[35].mxu1 }
 0x2bc   : > { %v1290_v5 = vadd.f32 %v2929_v57, %v1289_v3 }
 0x2bd   : > { %v1377_v8 = vmax.f32 %v1295_v2, 0.0 }
 0x2be   : > { %v1376_v6 = vmax.f32 %v1290_v5, 0.0 }
 0x2c0   : > { %2126 = vmatprep.mubr.f32.mxu0 %v1376_v6 }
 0x2c1   : > { %2127 = vmatmul.mubr.f32.gmra.mrb[34].mxu0 %v1377_v8 }
 0x2c8   : > { %v2051_v4 = vpop.f32.mrb[36].mxu1 }
 0x2c9   : > { %v1305_v48 = vadd.f32 %v2051_v4, %v2929_v57  ;;  %v1299_v9 = vpop.f32.mrb[37].mxu1 }
 0x2ca   : > { %v1300_v11 = vadd.f32 %v2929_v57, %v1299_v9 }
 0x2cb   : > { %v1379_v15 = vmax.f32 %v1305_v48, 0.0 }
 0x2cc   : > { %v1378_v14 = vmax.f32 %v1300_v11, 0.0 }
 0x2ce   : > { %2129 = vmatprep.mubr.f32.mxu0 %v1378_v14 }
 0x2cf   : > { %2130 = vmatmul.mubr.f32.gmra.mrb[36].mxu0 %v1379_v15 }
 0x2d2   : > { %v2054_v16 = vpop.f32.mrb[38].mxu1 }
 0x2d3   : > { %v1315_v18 = vadd.f32 %v2054_v16, %v2929_v57  ;;  %v1309_v20 = vpop.f32.mrb[39].mxu1 }
 0x2d4   : > { %v1310_v21 = vadd.f32 %v2929_v57, %v1309_v20 }
 0x2d5   : > { %v1381_v22 = vmax.f32 %v1315_v18, 0.0 }
 0x2d6   : > { %v1380_v19 = vmax.f32 %v1310_v21, 0.0 }
 0x2d8   : > { %2132 = vmatprep.mubr.f32.mxu0 %v1380_v19 }
 0x2d9   : > { %2133 = vmatmul.mubr.f32.gmra.mrb[38].mxu0 %v1381_v22 }
 0x2e0   : > { %v2057_v13 = vpop.f32.mrb[40].mxu1 }
 0x2e1   : > { %v1325_v23 = vadd.f32 %v2057_v13, %v2929_v57  ;;  %v1319_v24 = vpop.f32.mrb[41].mxu1 }
 0x2e2   : > { %v1320_v7 = vadd.f32 %v2929_v57, %v1319_v24 }
 0x2e3   : > { %v1383_v12 = vmax.f32 %v1325_v23, 0.0 }
 0x2e4   : > { %v1382_v17 = vmax.f32 %v1320_v7, 0.0 }
 0x2e6   : > { %2135 = vmatprep.mubr.f32.mxu0 %v1382_v17 }
 0x2e7   : > { %2136 = vmatmul.mubr.f32.gmra.mrb[40].mxu0 %v1383_v12 }
 0x2ea   : > { %v2060_v25 = vpop.f32.mrb[42].mxu1 }
 0x2eb   : > { %v1335_v26 = vadd.f32 %v2060_v25, %v2929_v57  ;;  %v1329_v27 = vpop.f32.mrb[43].mxu1 }
 0x2ec   : > { %v1330_v28 = vadd.f32 %v2929_v57, %v1329_v27 }
 0x2ed   : > { %v1385_v29 = vmax.f32 %v1335_v26, 0.0 }
 0x2ee   : > { %v1384_v1 = vmax.f32 %v1330_v28, 0.0 }
 0x2f0   : > { %2138 = vmatprep.mubr.f32.mxu0 %v1384_v1 }
 0x2f1   : > { %2139 = vmatmul.mubr.f32.gmra.mrb[42].mxu0 %v1385_v29 }
 0x2f8   : > { %v2063_v30 = vpop.f32.mrb[44].mxu1 }
 0x2f9   : > { %v1345_v31 = vadd.f32 %v2063_v30, %v2929_v57  ;;  %v1339_v32 = vpop.f32.mrb[45].mxu1 }
 0x2fa   : > { %v1340_v58 = vadd.f32 %v2929_v57, %v1339_v32 }
 0x2fb   : > { %v1387_v33 = vmax.f32 %v1345_v31, 0.0 }
 0x2fc   : > { %v1386_v0 = vmax.f32 %v1340_v58, 0.0 }
 0x2fe   : > { %2141 = vmatprep.mubr.f32.mxu0 %v1386_v0 }
 0x2ff   : > { %2142 = vmatmul.mubr.f32.gmra.mrb[44].mxu0 %v1387_v33 }
 0x302   : > { %v2066_v35 = vpop.f32.mrb[46].mxu1 }
 0x303   : > { %v1355_v36 = vadd.f32 %v2066_v35, %v2929_v57  ;;  %v1349_v37 = vpop.f32.mrb[47].mxu1 }
 0x304   : > { %v1350_v38 = vadd.f32 %v2929_v57, %v1349_v37 }
 0x305   : > { %v1389_v40 = vmax.f32 %v1355_v36, 0.0 }
 0x306   : > { %v1388_v39 = vmax.f32 %v1350_v38, 0.0 }
 0x308   : > { %2144 = vmatprep.mubr.f32.mxu0 %v1388_v39 }
 0x309   : > { %2145 = vmatmul.mubr.f32.gmra.mrb[46].mxu0 %v1389_v40 }
 0x349   : > { %v2101_v34 = vpop.f32.mrb[16].mxu0 }
 0x34a   : > { %v1485_v42 = vadd.f32 %v2101_v34, %v2969_v41  ;;  %v1479_v43 = vpop.f32.mrb[17].mxu0 }
 0x34b   : > { %v1480_v44 = vadd.f32 %v2969_v41, %v1479_v43 }
 0x34c   : > { %1639 = vst [vmem:[%s2973_s25 + $0x8] sm:$0xff] %v1485_v42 }
 0x34d   : > { %1638 = vst [vmem:[%s2973_s25] sm:$0xff] %v1480_v44 }
 0x34e   : > { %v2104_v57 = vpop.f32.mrb[18].mxu0 }
 0x34f   : > { %v1495_v10 = vadd.f32 %v2104_v57, %v2969_v41  ;;  %v1489_v45 = vpop.f32.mrb[19].mxu0 }
 0x350   : > { %v1490_v46 = vadd.f32 %v2969_v41, %v1489_v45 }
 0x351   : > { %1641 = vst [vmem:[%s2973_s25 + $0x18] sm:$0xff] %v1495_v10 }
 0x352   : > { %1640 = vst [vmem:[%s2973_s25 + $0x10] sm:$0xff] %v1490_v46  ;;  %v2107_v47 = vpop.f32.mrb[20].mxu0 }
 0x353   : > { %v1505_v49 = vadd.f32 %v2107_v47, %v2969_v41  ;;  %v1499_v50 = vpop.f32.mrb[21].mxu0 }
 0x354   : > { %v1500_v51 = vadd.f32 %v2969_v41, %v1499_v50 }
 0x355   : > { %1643 = vst [vmem:[%s2973_s25 + $0x28] sm:$0xff] %v1505_v49 }
 0x356   : > { %1642 = vst [vmem:[%s2973_s25 + $0x20] sm:$0xff] %v1500_v51  ;;  %v2110_v52 = vpop.f32.mrb[22].mxu0 }
 0x357   : > { %v1515_v53 = vadd.f32 %v2110_v52, %v2969_v41  ;;  %v1509_v54 = vpop.f32.mrb[23].mxu0 }
 0x358   : > { %v1510_v55 = vadd.f32 %v2969_v41, %v1509_v54 }
 0x359   : > { %1645 = vst [vmem:[%s2973_s25 + $0x38] sm:$0xff] %v1515_v53 }
 0x35a   : > { %1644 = vst [vmem:[%s2973_s25 + $0x30] sm:$0xff] %v1510_v55  ;;  %v2113_v56 = vpop.f32.mrb[24].mxu0 }
 0x35b   : > { %v1525_v59 = vadd.f32 %v2113_v56, %v2969_v41  ;;  %v1519_v60 = vpop.f32.mrb[25].mxu0 }
 0x35c   : > { %v1520_v61 = vadd.f32 %v2969_v41, %v1519_v60 }
 0x35d   : > { %1647 = vst [vmem:[%s2973_s25 + $0x48] sm:$0xff] %v1525_v59 }
 0x35e   : > { %1646 = vst [vmem:[%s2973_s25 + $0x40] sm:$0xff] %v1520_v61 }
 0x364   : > { %v2116_v62 = vpop.f32.mrb[26].mxu0 }
 0x365   : > { %v1535_v63 = vadd.f32 %v2116_v62, %v2969_v41  ;;  %v1529_v2 = vpop.f32.mrb[27].mxu0 }
 0x366   : > { %v1530_v3 = vadd.f32 %v2969_v41, %v1529_v2 }
 0x367   : > { %1649 = vst [vmem:[%s2973_s25 + $0x58] sm:$0xff] %v1535_v63 }
 0x368   : > { %1648 = vst [vmem:[%s2973_s25 + $0x50] sm:$0xff] %v1530_v3 }
 0x372   : > { %v2119_v5 = vpop.f32.mrb[28].mxu0 }
 0x373   : > { %v1545_v6 = vadd.f32 %v2119_v5, %v2969_v41  ;;  %v1539_v8 = vpop.f32.mrb[29].mxu0 }
 0x374   : > { %v1540_v4 = vadd.f32 %v2969_v41, %v1539_v8 }
 0x375   : > { %1651 = vst [vmem:[%s2973_s25 + $0x68] sm:$0xff] %v1545_v6 }
 0x376   : > { %1650 = vst [vmem:[%s2973_s25 + $0x60] sm:$0xff] %v1540_v4 }
 0x37c   : > { %v2122_v48 = vpop.f32.mrb[30].mxu0 }
 0x37d   : > { %v1555_v9 = vadd.f32 %v2122_v48, %v2969_v41  ;;  %v1549_v11 = vpop.f32.mrb[31].mxu0 }
 0x37e   : > { %v1550_v14 = vadd.f32 %v2969_v41, %v1549_v11 }
 0x37f   : > { %1653 = vst [vmem:[%s2973_s25 + $0x78] sm:$0xff] %v1555_v9 }
 0x380   : > { %1652 = vst [vmem:[%s2973_s25 + $0x70] sm:$0xff] %v1550_v14 }
 0x38a   : > { %v2125_v15 = vpop.f32.mrb[32].mxu0 }
 0x38b   : > { %v1565_v16 = vadd.f32 %v2125_v15, %v2969_v41  ;;  %v1559_v18 = vpop.f32.mrb[33].mxu0 }
 0x38c   : > { %v1560_v20 = vadd.f32 %v2969_v41, %v1559_v18 }
 0x38d   : > { %1655 = vst [vmem:[%s2973_s25 + $0x88] sm:$0xff] %v1565_v16 }
 0x38e   : > { %1654 = vst [vmem:[%s2973_s25 + $0x80] sm:$0xff] %v1560_v20 }
 0x394   : > { %v2128_v21 = vpop.f32.mrb[34].mxu0 }
 0x395   : > { %v1575_v19 = vadd.f32 %v2128_v21, %v2969_v41  ;;  %v1569_v22 = vpop.f32.mrb[35].mxu0 }
 0x396   : > { %v1570_v13 = vadd.f32 %v2969_v41, %v1569_v22 }
 0x397   : > { %1657 = vst [vmem:[%s2973_s25 + $0x98] sm:$0xff] %v1575_v19 }
 0x398   : > { %1656 = vst [vmem:[%s2973_s25 + $0x90] sm:$0xff] %v1570_v13 }
 0x3a2   : > { %v2131_v23 = vpop.f32.mrb[36].mxu0 }
 0x3a3   : > { %v1585_v24 = vadd.f32 %v2131_v23, %v2969_v41  ;;  %v1579_v7 = vpop.f32.mrb[37].mxu0 }
 0x3a4   : > { %v1580_v17 = vadd.f32 %v2969_v41, %v1579_v7 }
 0x3a5   : > { %1659 = vst [vmem:[%s2973_s25 + $0xa8] sm:$0xff] %v1585_v24 }
 0x3a6   : > { %1658 = vst [vmem:[%s2973_s25 + $0xa0] sm:$0xff] %v1580_v17 }
 0x3ac   : > { %v2134_v12 = vpop.f32.mrb[38].mxu0 }
 0x3ad   : > { %v1595_v25 = vadd.f32 %v2134_v12, %v2969_v41  ;;  %v1589_v26 = vpop.f32.mrb[39].mxu0 }
 0x3ae   : > { %v1590_v27 = vadd.f32 %v2969_v41, %v1589_v26 }
 0x3af   : > { %1661 = vst [vmem:[%s2973_s25 + $0xb8] sm:$0xff] %v1595_v25 }
 0x3b0   : > { %1660 = vst [vmem:[%s2973_s25 + $0xb0] sm:$0xff] %v1590_v27 }
 0x3ba   : > { %v2137_v28 = vpop.f32.mrb[40].mxu0 }
 0x3bb   : > { %v1605_v1 = vadd.f32 %v2137_v28, %v2969_v41  ;;  %v1599_v29 = vpop.f32.mrb[41].mxu0 }
 0x3bc   : > { %v1600_v30 = vadd.f32 %v2969_v41, %v1599_v29 }
 0x3bd   : > { %1663 = vst [vmem:[%s2973_s25 + $0xc8] sm:$0xff] %v1605_v1 }
 0x3be   : > { %1662 = vst [vmem:[%s2973_s25 + $0xc0] sm:$0xff] %v1600_v30 }
 0x3c4   : > { %v2140_v31 = vpop.f32.mrb[42].mxu0 }
 0x3c5   : > { %v1615_v32 = vadd.f32 %v2140_v31, %v2969_v41  ;;  %v1609_v58 = vpop.f32.mrb[43].mxu0 }
 0x3c6   : > { %v1610_v0 = vadd.f32 %v2969_v41, %v1609_v58 }
 0x3c7   : > { %1665 = vst [vmem:[%s2973_s25 + $0xd8] sm:$0xff] %v1615_v32 }
 0x3c8   : > { %1664 = vst [vmem:[%s2973_s25 + $0xd0] sm:$0xff] %v1610_v0 }
 0x3d2   : > { %v2143_v33 = vpop.f32.mrb[44].mxu0 }
 0x3d3   : > { %v1625_v35 = vadd.f32 %v2143_v33, %v2969_v41  ;;  %v1619_v36 = vpop.f32.mrb[45].mxu0 }
 0x3d4   : > { %v1620_v37 = vadd.f32 %v2969_v41, %v1619_v36 }
 0x3d5   : > { %1667 = vst [vmem:[%s2973_s25 + $0xe8] sm:$0xff] %v1625_v35 }
 0x3d6   : > { %1666 = vst [vmem:[%s2973_s25 + $0xe0] sm:$0xff] %v1620_v37 }
 0x3dc   : > { %v2146_v38 = vpop.f32.mrb[46].mxu0 }
 0x3dd   : > { %v1635_v39 = vadd.f32 %v2146_v38, %v2969_v41  ;;  %v1629_v40 = vpop.f32.mrb[47].mxu0 }
 0x3de   : > { %v1630_v34 = vadd.f32 %v2969_v41, %v1629_v40 }
 0x3df   : > { %1669 = vst [vmem:[%s2973_s25 + $0xf8] sm:$0xff] %v1635_v39 }
 0x3e0   : > { %1668 = vst [vmem:[%s2973_s25 + $0xf0] sm:$0xff] %v1630_v34 }
 0x3e1   : > { %2349 = shalt.err (!%p2346_p3)
}
 0x3e2   : > { %s2350_s24 = scalar_lea.hbm %s3039_s21, 4096  ;;  %s2354_s29 = scalar_lea.hbm %s3098_s9, 16384 }
 0x3e3   : > { %p2351_p4 = scmp.ne.s32.totalorder %s3039_s21, %s2350_s24  ;;  %p2355_p9 = scmp.lt.u32.totalorder %s3039_s21, %s3098_s9 }
 0x3e4   : > { %p2356_p10 = scmp.lt.u32.totalorder %s2354_s29, %s2350_s24  ;;  %p2358_p12 = scmp.lt.u32.totalorder %s2350_s24, %s3039_s21 }
 0x3e5   : > { %p2352_p7 = pnand %p2351_p4, %p2493_p5 }
 0x3e6   : > { %p2357_p11 = por %p2356_p10, %p2355_p9 }
 0x3e7   : > { %p2353_p8 = pneg %p2352_p7 }
 0x3e8   : > { %p2359_p13 = por %p2358_p12, %p2357_p11 }
 0x3ea   : > { %p2360_p0 = pnand %p2359_p13, %p2353_p8 }
 0x3ec   : > { %2363 = shalt.err (!%p2360_p0)
}
 0x3ed   : > { %s2403_s22 = smov 128   ;;  %s2404_s23 = smov 8  }
 0x3ee   : > { %2259 = dma.vmem_to_hbm [thread:$0]  (%p2493_p5), %s3041_s14, 4096, %s3039_s21, %s3048_s13, %s2403_s22, %s2403_s22, %s2404_s23  }
 0x3ef PF: > { %p2265_p1 = scmp.ge.s32.totalorder %s2398_s12, 2  ;;  %s1699_s26 = sand.u32 1, %s2386_s30  }
 0x3f0   : > { %s1700_s27 = scalar_lea.sflag [#allocation3], %s1699_s26 }
 0x3f1   : > { %p2262_p2 = pnand %p2265_p1, %p2497_p6 }
 0x3f3   : > { %2381 = dma.done.wait (!%p2262_p2), %s1700_s27, 4096  }
 0x3f4   : > { %2383 = vsyncadd (!%p2262_p2), %s1700_s27, 4294963200  ;;  %p19_p3 = scmp.ge.s32.totalorder %s2480_s15, 6   ;;  %s3101_s30 = smov %s2390_s10 }
 0x3f5   : > { %s3102_s10 = smov %s2394_s11  ;;  %s3103_s11 = smov %s2491_s18 }
 0x3f6   : > { %s3104_s12 = smov %s2480_s15  ;;  %21 = sbr.rel (!%p19_p3) target bundleno = 3 (0x3), region = 91 }
 0x3fd   :  { %1705 = vsyncpa [#allocation3], 1 }
 0x3fe   :  { %1707 = vsyncpa [#allocation3 + $0x1], 1 }

</bundles_post_ra>
